<compile_context>
chip_gen: v7x
topology: tpu7x:2x2x1
jax: 0.10.0
libtpu: 0.0.40
codegen_flags: <defaults>
</compile_context>

<pallas_src>
import jax
import jax.numpy as jnp
from jax import lax
from jax.experimental import pallas as pl
from jax.experimental.pallas import tpu as pltpu

# ---- static model geometry --------------------------------------------------
K = 3                       # conv kernel size
RW = 49                     # raster width (input is 49x49 so dense sees 10*43*43)
C1 = C2 = C3 = 10           # conv channels
CP = 16                     # channels padded to one bf16 sublane tile
V3 = RW - 2 * K             # 43: valid conv3 output extent
HW_FLAT = RW * RW           # 2401 flat raster positions
CW = 256                    # lanes processed per chunk (fits the vreg file)
HALO = 128                  # >= 2*RW + 2 = 100 window reach, keeps loads aligned
OFFS = tuple(dy * RW + dx for dy in range(K) for dx in range(K))

# Flat-raster compute widths (multiples of CW -> aligned chunk loops, unmasked
# stores).  Positions outside the valid window hold finite junk that always meets
# a zero weight downstream (load-bearing invariant, asserted below).
N3 = 2304                   # conv3 width
N2 = 2560                   # conv2 width
N1 = 2816                   # conv1 width
W_IN = 2944                 # zero-padded input width
OUT_PAD = 128               # lane-padded output row

assert HALO >= 2 * RW + 2                      # conv window reach on the raster
assert N3 > 42 * RW + 42                       # every valid conv3 position exists
assert N2 >= N3 + HALO and N1 >= N2 + HALO and W_IN >= N1 + HALO
assert W_IN >= HW_FLAT
assert N1 % CW == 0 and N2 % CW == 0 and N3 % CW == 0 and (CW + HALO) % 128 == 0


def _softplus(x):
    # torch.nn.Softplus(beta=1, threshold=20) with only 2 EUP transcendentals:
    #   softplus(x) = max(x, 0) + log(1 + exp(-|x|));  return x for x > 20.
    # For very negative x, 1 + e rounds to 1 in f32, so return e (= exp(x)) there.
    e = jnp.exp(-jnp.abs(x))
    soft = jnp.maximum(x, 0.0) + jnp.log(1.0 + e)
    soft = jnp.where(x < -8.0, e, soft)
    return jnp.where(x > 20.0, x, soft)


def _drama_kernel(x_ref, w1_ref, b1_ref, w2_ref, b2_ref, w3_ref, b3_ref,
                  g_ref, bdrow_ref, o_ref, act1_ref, act2_ref):
    f32 = jnp.float32

    def im2col(wide):
        # wide: (CP, CW + HALO) -> (9*CP, CW) tap-stacked slab (tile-aligned concat).
        return jnp.concatenate([wide[:, o:o + CW] for o in OFFS], axis=0)

    # ---- conv1 (cin = 1) + softplus on the VPU, chunked over lanes ----------
    w1 = w1_ref[...]                               # (CP, 9)  f32, zero pad rows
    b1 = b1_ref[...]                               # (CP, 1)  f32

    def conv1_chunk(j, carry):
        base = pl.multiple_of(j * CW, CW)
        wide = x_ref[0, :, pl.ds(base, CW + HALO)]            # (1, CW+HALO) f32
        acc = jnp.zeros((CP, CW), f32)
        for t, off in enumerate(OFFS):
            acc = acc + w1[:, t:t + 1] * wide[:, off:off + CW]
        act1_ref[:, pl.ds(base, CW)] = _softplus(acc + b1).astype(act1_ref.dtype)
        return carry

    lax.fori_loop(0, N1 // CW, conv1_chunk, 0)

    # ---- conv2 + softplus: one (CP,9CP)@(9CP,CW) MXU matmul per chunk -------
    w2 = w2_ref[...]                               # (CP, 9*CP) bf16
    b2 = b2_ref[...]                               # (CP, 1)    f32

    def conv2_chunk(j, carry):
        base = pl.multiple_of(j * CW, CW)
        slab = im2col(act1_ref[:, pl.ds(base, CW + HALO)])        # (9CP, CW) bf16
        z = jnp.dot(w2, slab, preferred_element_type=f32) + b2    # (CP, CW)  f32
        act2_ref[:, pl.ds(base, CW)] = _softplus(z).astype(act2_ref.dtype)
        return carry

    lax.fori_loop(0, N2 // CW, conv2_chunk, 0)

    # ---- conv3 + softplus + dense, fused per chunk (y3 never stored) --------
    # q[c, k*CP + c'] accumulates sum_p y3[c, p] * G[p, k*CP + c']; the dense
    # result only needs the "diagonal" c == c' entries.
    w3 = w3_ref[...]
    b3 = b3_ref[...]

    def conv3_chunk(j, q):
        base = pl.multiple_of(j * CW, CW)
        slab = im2col(act2_ref[:, pl.ds(base, CW + HALO)])        # (9CP, CW) bf16
        z = jnp.dot(w3, slab, preferred_element_type=f32) + b3
        y = _softplus(z)                                          # (CP, CW) f32
        g = g_ref[pl.ds(base, CW), :]                             # (CW, 2CP) bf16
        return q + jnp.dot(y.astype(g.dtype), g, preferred_element_type=f32)

    q = lax.fori_loop(0, N3 // CW, conv3_chunk, jnp.zeros((CP, 2 * CP), f32))

    # Diagonal extraction + bias, emitted as one unmasked (1, OUT_PAD) store.
    row_i = lax.broadcasted_iota(jnp.int32, (CP, 2 * CP), 0)
    col_i = lax.broadcasted_iota(jnp.int32, (CP, 2 * CP), 1)
    diag = jnp.where((col_i & (CP - 1)) == row_i, q, 0.0)
    per_c = jnp.sum(diag, axis=0, keepdims=True)                  # (1, 2CP)
    s0 = jnp.sum(per_c[:, :CP], axis=1, keepdims=True)            # (1, 1)
    s1 = jnp.sum(per_c[:, CP:], axis=1, keepdims=True)            # (1, 1)
    lane = lax.broadcasted_iota(jnp.int32, (1, OUT_PAD), 1)
    row = jnp.where(lane == 0, s0, jnp.where(lane == 1, s1, 0.0)) + bdrow_ref[...]
    o_ref[0] = row.astype(o_ref.dtype)


@jax.jit
def drama_forward(params, x_nchw):
    B = x_nchw.shape[0]
    f32 = jnp.float32
    bf16 = jnp.bfloat16

    # ---- plain-JAX glue: flat raster input + matmul-ready weights ----------
    x_flat = x_nchw.reshape(B, 1, HW_FLAT).astype(f32)
    x_flat = jnp.pad(x_flat, ((0, 0), (0, 0), (0, W_IN - HW_FLAT)))     # (B,1,W_IN)

    def pad_bias(b):
        return jnp.pad(b.reshape(-1, 1), ((0, CP - b.shape[0]), (0, 0))).astype(f32)

    def conv_mat(w):
        # torch (cout, cin, ky, kx) -> (CP, 9*CP); column = (ky*3+kx)*CP + cin,
        # with zero rows/columns for the 6 pad channels.
        cout, cin = w.shape[0], w.shape[1]
        wt = jnp.transpose(w, (0, 2, 3, 1)).reshape(cout, K * K, cin)
        wt = jnp.pad(wt, ((0, CP - cout), (0, 0), (0, CP - cin)))
        return wt.reshape(CP, K * K * CP).astype(bf16)

    w1 = jnp.pad(params["conv1_w"].reshape(C1, K * K),
                 ((0, CP - C1), (0, 0))).astype(f32)                    # (CP, 9)
    b1 = pad_bias(params["conv1_b"])
    w2 = conv_mat(params["conv2_w"]); b2 = pad_bias(params["conv2_b"])
    w3 = conv_mat(params["conv3_w"]); b3 = pad_bias(params["conv3_b"])

    # Dense weight folded with torch's NCHW .view() flatten: G[p, k*CP + c] holds
    # dense_w[k, c*43*43 + i*43 + j] at raster p = i*49 + j, zero at every
    # never-valid raster position and pad channel (so junk columns drop out).
    wd = params["dense_w"].reshape(2, C3, V3, V3).astype(f32)
    wd = jnp.pad(wd, ((0, 0), (0, CP - C3), (0, RW - V3), (0, RW - V3)))
    wd = wd.reshape(2, CP, HW_FLAT)[:, :, :N3]                          # (2, CP, N3)
    g = jnp.transpose(wd, (2, 0, 1)).reshape(N3, 2 * CP).astype(bf16)   # (N3, 2CP)
    bdrow = jnp.zeros((1, OUT_PAD), f32).at[0, 0:2].set(
        params["dense_b"].astype(f32))

    out = pl.pallas_call(
        _drama_kernel,
        out_shape=jax.ShapeDtypeStruct((B, 1, OUT_PAD), f32),
        grid=(B,),
        in_specs=[
            pl.BlockSpec((1, 1, W_IN), lambda i: (i, 0, 0)),
            pl.BlockSpec((CP, K * K), lambda i: (0, 0)),
            pl.BlockSpec((CP, 1), lambda i: (0, 0)),
            pl.BlockSpec((CP, K * K * CP), lambda i: (0, 0)),
            pl.BlockSpec((CP, 1), lambda i: (0, 0)),
            pl.BlockSpec((CP, K * K * CP), lambda i: (0, 0)),
            pl.BlockSpec((CP, 1), lambda i: (0, 0)),
            pl.BlockSpec((N3, 2 * CP), lambda i: (0, 0)),
            pl.BlockSpec((1, OUT_PAD), lambda i: (0, 0)),
        ],
        out_specs=pl.BlockSpec((1, 1, OUT_PAD), lambda i: (i, 0, 0)),
        scratch_shapes=[
            pltpu.VMEM((CP, N1), jnp.bfloat16),   # conv1 activations
            pltpu.VMEM((CP, N2), jnp.bfloat16),   # conv2 activations
        ],
        compiler_params=pltpu.CompilerParams(dimension_semantics=("parallel",)),
    )(x_flat, w1, b1, w2, b2, w3, b3, g, bdrow)

    res = out[:, 0, :2]                 # glue: drop lane padding
    # torch returns (res, self.dense.weight.data)
    return res, params["dense_w"]


def drama_reference(params, x):
    # Pure-JAX f32 reference of the torch forward (for the self-check).
    def conv(h, w, b):
        y = lax.conv_general_dilated(h, w, (1, 1), "VALID",
                                     dimension_numbers=("NCHW", "OIHW", "NCHW"))
        return y + b.reshape(1, -1, 1, 1)

    def sp(t):
        return jnp.where(t > 20.0, t, jnp.log1p(jnp.exp(jnp.minimum(t, 20.0))))

    a1 = sp(conv(x, params["conv1_w"], params["conv1_b"]))
    a2 = sp(conv(a1, params["conv2_w"], params["conv2_b"]))
    a3 = sp(conv(a2, params["conv3_w"], params["conv3_b"]))
    flat = a3.reshape(x.shape[0], -1)
    return flat @ params["dense_w"].T + params["dense_b"]


def init_params(key):
    # Deterministic init mimicking PyTorch's default uniform(-1/sqrt(fan_in), +).
    def uconv(kw, kb, cout, cin, k):
        fan_in = cin * k * k
        bound = 1.0 / float(fan_in) ** 0.5
        w = jax.random.uniform(kw, (cout, cin, k, k), jnp.float32, -bound, bound)
        b = jax.random.uniform(kb, (cout,), jnp.float32, -bound, bound)
        return w, b

    keys = jax.random.split(key, 8)
    c1w, c1b = uconv(keys[0], keys[1], C1, 1, K)
    c2w, c2b = uconv(keys[2], keys[3], C2, C1, K)
    c3w, c3b = uconv(keys[4], keys[5], C3, C2, K)
    fan_in = C3 * V3 * V3
    bound = 1.0 / float(fan_in) ** 0.5
    dw = jax.random.uniform(keys[6], (2, fan_in), jnp.float32, -bound, bound)
    db = jax.random.uniform(keys[7], (2,), jnp.float32, -bound, bound)
    return dict(conv1_w=c1w, conv1_b=c1b, conv2_w=c2w, conv2_b=c2b,
                conv3_w=c3w, conv3_b=c3b, dense_w=dw, dense_b=db)


if __name__ == "__main__":
    key = jax.random.PRNGKey(0)
    pkey, xkey = jax.random.split(key)
    params = init_params(pkey)
    # Dense expects 10*43*43 features => three valid 3x3 convs => 49x49x1 input.
    x = jax.random.normal(xkey, (2, 1, 49, 49), dtype=jnp.float32)

    res, dense_weight = drama_forward(params, x)
    jax.block_until_ready((res, dense_weight))

    assert res.shape == (2, 2)
    assert dense_weight.shape == (2, 10 * V3 * V3)
    assert bool(jnp.all(jnp.isfinite(res)))

    # Numerical self-check vs. f32 reference (bf16 matmul operands in the kernel).
    ref = drama_reference(params, x)
    err = float(jnp.max(jnp.abs(res - ref)))
    assert err < 5e-2, f"max abs error {err} vs reference {ref} got {res}"

    print("KERNEL_OK")
</pallas_src>

<mosaic_0001>
module attributes {stable_mosaic.version = 11 : i64} {
  func.func @_drama_kernel(%arg0: i32, %arg1: memref<1x1x2944xf32, #tpu.memory_space<vmem>>, %arg2: memref<16x9xf32, #tpu.memory_space<vmem>>, %arg3: memref<16x1xf32, #tpu.memory_space<vmem>>, %arg4: memref<16x144xbf16, #tpu.memory_space<vmem>>, %arg5: memref<16x1xf32, #tpu.memory_space<vmem>>, %arg6: memref<16x144xbf16, #tpu.memory_space<vmem>>, %arg7: memref<16x1xf32, #tpu.memory_space<vmem>>, %arg8: memref<2304x32xbf16, #tpu.memory_space<vmem>>, %arg9: memref<1x128xf32, #tpu.memory_space<vmem>>, %arg10: memref<1x1x128xf32, #tpu.memory_space<vmem>>, %arg11: memref<16x2816xbf16, #tpu.memory_space<vmem>>, %arg12: memref<16x2560xbf16, #tpu.memory_space<vmem>>) attributes {dimension_semantics = [#tpu.dimension_semantics<parallel>], iteration_bounds = array<i64: 2>, scalar_prefetch = 0 : i64, scratch_operands = 2 : i64, tpu.core_type = #tpu.core_type<tc>, window_params = [{transform_indices = @transform_0, window_bounds = array<i64: 1, 1, 2944>}, {pipeline_mode = #tpu.pipeline_mode<synchronous>, transform_indices = @transform_1, window_bounds = array<i64: 16, 9>}, {pipeline_mode = #tpu.pipeline_mode<synchronous>, transform_indices = @transform_2, window_bounds = array<i64: 16, 1>}, {pipeline_mode = #tpu.pipeline_mode<synchronous>, transform_indices = @transform_3, window_bounds = array<i64: 16, 144>}, {pipeline_mode = #tpu.pipeline_mode<synchronous>, transform_indices = @transform_4, window_bounds = array<i64: 16, 1>}, {pipeline_mode = #tpu.pipeline_mode<synchronous>, transform_indices = @transform_5, window_bounds = array<i64: 16, 144>}, {pipeline_mode = #tpu.pipeline_mode<synchronous>, transform_indices = @transform_6, window_bounds = array<i64: 16, 1>}, {pipeline_mode = #tpu.pipeline_mode<synchronous>, transform_indices = @transform_7, window_bounds = array<i64: 2304, 32>}, {pipeline_mode = #tpu.pipeline_mode<synchronous>, transform_indices = @transform_8, window_bounds = array<i64: 1, 128>}, {transform_indices = @transform_9, window_bounds = array<i64: 1, 1, 128>}]} {
    %c0 = arith.constant 0 : index
    %c0_0 = arith.constant 0 : index
    %0 = vector.load %arg2[%c0, %c0_0] : memref<16x9xf32, #tpu.memory_space<vmem>>, vector<16x9xf32>
    %c0_1 = arith.constant 0 : index
    %c0_2 = arith.constant 0 : index
    %1 = vector.load %arg3[%c0_1, %c0_2] : memref<16x1xf32, #tpu.memory_space<vmem>>, vector<16x1xf32>
    %c0_i32 = arith.constant 0 : i32
    %c11_i32 = arith.constant 11 : i32
    %2 = arith.addi %c0_i32, %c11_i32 : i32
    %c1_i32 = arith.constant 1 : i32
    scf.for %arg13 = %c0_i32 to %2 step %c1_i32  : i32 {
      %c256_i32 = arith.constant 256 : i32
      %43 = arith.muli %arg13, %c256_i32 : i32
      %44 = tpu.assume_multiple %43, 256 : i32
      %c0_30 = arith.constant 0 : index
      %c0_31 = arith.constant 0 : index
      %45 = arith.index_cast %44 : i32 to index
      %46 = vector.load %arg1[%c0_30, %c0_31, %45] : memref<1x1x2944xf32, #tpu.memory_space<vmem>>, vector<1x1x384xf32>
      %47 = vector.shape_cast %46 : vector<1x1x384xf32> to vector<1x384xf32>
      %cst_32 = arith.constant 0.000000e+00 : f32
      %48 = vector.broadcast %cst_32 : f32 to vector<16x256xf32>
      %49 = vector.extract_strided_slice %0 {offsets = [0, 0], sizes = [16, 1], strides = [1, 1]} : vector<16x9xf32> to vector<16x1xf32>
      %50 = vector.extract_strided_slice %47 {offsets = [0, 0], sizes = [1, 256], strides = [1, 1]} : vector<1x384xf32> to vector<1x256xf32>
      %51 = vector.broadcast %49 : vector<16x1xf32> to vector<16x256xf32>
      %52 = vector.broadcast %50 : vector<1x256xf32> to vector<16x256xf32>
      %53 = arith.mulf %51, %52 : vector<16x256xf32>
      %54 = arith.addf %48, %53 : vector<16x256xf32>
      %55 = vector.extract_strided_slice %0 {offsets = [0, 1], sizes = [16, 1], strides = [1, 1]} : vector<16x9xf32> to vector<16x1xf32>
      %56 = vector.extract_strided_slice %47 {offsets = [0, 1], sizes = [1, 256], strides = [1, 1]} : vector<1x384xf32> to vector<1x256xf32>
      %57 = vector.broadcast %55 : vector<16x1xf32> to vector<16x256xf32>
      %58 = vector.broadcast %56 : vector<1x256xf32> to vector<16x256xf32>
      %59 = arith.mulf %57, %58 : vector<16x256xf32>
      %60 = arith.addf %54, %59 : vector<16x256xf32>
      %61 = vector.extract_strided_slice %0 {offsets = [0, 2], sizes = [16, 1], strides = [1, 1]} : vector<16x9xf32> to vector<16x1xf32>
      %62 = vector.extract_strided_slice %47 {offsets = [0, 2], sizes = [1, 256], strides = [1, 1]} : vector<1x384xf32> to vector<1x256xf32>
      %63 = vector.broadcast %61 : vector<16x1xf32> to vector<16x256xf32>
      %64 = vector.broadcast %62 : vector<1x256xf32> to vector<16x256xf32>
      %65 = arith.mulf %63, %64 : vector<16x256xf32>
      %66 = arith.addf %60, %65 : vector<16x256xf32>
      %67 = vector.extract_strided_slice %0 {offsets = [0, 3], sizes = [16, 1], strides = [1, 1]} : vector<16x9xf32> to vector<16x1xf32>
      %68 = vector.extract_strided_slice %47 {offsets = [0, 49], sizes = [1, 256], strides = [1, 1]} : vector<1x384xf32> to vector<1x256xf32>
      %69 = vector.broadcast %67 : vector<16x1xf32> to vector<16x256xf32>
      %70 = vector.broadcast %68 : vector<1x256xf32> to vector<16x256xf32>
      %71 = arith.mulf %69, %70 : vector<16x256xf32>
      %72 = arith.addf %66, %71 : vector<16x256xf32>
      %73 = vector.extract_strided_slice %0 {offsets = [0, 4], sizes = [16, 1], strides = [1, 1]} : vector<16x9xf32> to vector<16x1xf32>
      %74 = vector.extract_strided_slice %47 {offsets = [0, 50], sizes = [1, 256], strides = [1, 1]} : vector<1x384xf32> to vector<1x256xf32>
      %75 = vector.broadcast %73 : vector<16x1xf32> to vector<16x256xf32>
      %76 = vector.broadcast %74 : vector<1x256xf32> to vector<16x256xf32>
      %77 = arith.mulf %75, %76 : vector<16x256xf32>
      %78 = arith.addf %72, %77 : vector<16x256xf32>
      %79 = vector.extract_strided_slice %0 {offsets = [0, 5], sizes = [16, 1], strides = [1, 1]} : vector<16x9xf32> to vector<16x1xf32>
      %80 = vector.extract_strided_slice %47 {offsets = [0, 51], sizes = [1, 256], strides = [1, 1]} : vector<1x384xf32> to vector<1x256xf32>
      %81 = vector.broadcast %79 : vector<16x1xf32> to vector<16x256xf32>
      %82 = vector.broadcast %80 : vector<1x256xf32> to vector<16x256xf32>
      %83 = arith.mulf %81, %82 : vector<16x256xf32>
      %84 = arith.addf %78, %83 : vector<16x256xf32>
      %85 = vector.extract_strided_slice %0 {offsets = [0, 6], sizes = [16, 1], strides = [1, 1]} : vector<16x9xf32> to vector<16x1xf32>
      %86 = vector.extract_strided_slice %47 {offsets = [0, 98], sizes = [1, 256], strides = [1, 1]} : vector<1x384xf32> to vector<1x256xf32>
      %87 = vector.broadcast %85 : vector<16x1xf32> to vector<16x256xf32>
      %88 = vector.broadcast %86 : vector<1x256xf32> to vector<16x256xf32>
      %89 = arith.mulf %87, %88 : vector<16x256xf32>
      %90 = arith.addf %84, %89 : vector<16x256xf32>
      %91 = vector.extract_strided_slice %0 {offsets = [0, 7], sizes = [16, 1], strides = [1, 1]} : vector<16x9xf32> to vector<16x1xf32>
      %92 = vector.extract_strided_slice %47 {offsets = [0, 99], sizes = [1, 256], strides = [1, 1]} : vector<1x384xf32> to vector<1x256xf32>
      %93 = vector.broadcast %91 : vector<16x1xf32> to vector<16x256xf32>
      %94 = vector.broadcast %92 : vector<1x256xf32> to vector<16x256xf32>
      %95 = arith.mulf %93, %94 : vector<16x256xf32>
      %96 = arith.addf %90, %95 : vector<16x256xf32>
      %97 = vector.extract_strided_slice %0 {offsets = [0, 8], sizes = [16, 1], strides = [1, 1]} : vector<16x9xf32> to vector<16x1xf32>
      %98 = vector.extract_strided_slice %47 {offsets = [0, 100], sizes = [1, 256], strides = [1, 1]} : vector<1x384xf32> to vector<1x256xf32>
      %99 = vector.broadcast %97 : vector<16x1xf32> to vector<16x256xf32>
      %100 = vector.broadcast %98 : vector<1x256xf32> to vector<16x256xf32>
      %101 = arith.mulf %99, %100 : vector<16x256xf32>
      %102 = arith.addf %96, %101 : vector<16x256xf32>
      %103 = vector.broadcast %1 : vector<16x1xf32> to vector<16x256xf32>
      %104 = arith.addf %102, %103 : vector<16x256xf32>
      %105 = math.absf %104 : vector<16x256xf32>
      %cst_33 = arith.constant 0.000000e+00 : f32
      %106 = vector.broadcast %cst_33 : f32 to vector<16x256xf32>
      %107 = arith.subf %106, %105 : vector<16x256xf32>
      %108 = math.exp %107 : vector<16x256xf32>
      %cst_34 = arith.constant 0.000000e+00 : f32
      %109 = vector.broadcast %cst_34 : f32 to vector<16x256xf32>
      %110 = arith.maximumf %104, %109 : vector<16x256xf32>
      %cst_35 = arith.constant 1.000000e+00 : f32
      %111 = vector.broadcast %cst_35 : f32 to vector<16x256xf32>
      %112 = arith.addf %111, %108 : vector<16x256xf32>
      %113 = math.log %112 : vector<16x256xf32>
      %114 = arith.addf %110, %113 : vector<16x256xf32>
      %cst_36 = arith.constant -8.000000e+00 : f32
      %115 = vector.broadcast %cst_36 : f32 to vector<16x256xf32>
      %116 = arith.cmpf olt, %104, %115 : vector<16x256xf32>
      %117 = arith.select %116, %108, %114 : vector<16x256xi1>, vector<16x256xf32>
      %cst_37 = arith.constant 2.000000e+01 : f32
      %118 = vector.broadcast %cst_37 : f32 to vector<16x256xf32>
      %119 = arith.cmpf ogt, %104, %118 : vector<16x256xf32>
      %120 = arith.select %119, %104, %117 : vector<16x256xi1>, vector<16x256xf32>
      %121 = arith.truncf %120 : vector<16x256xf32> to vector<16x256xbf16>
      %c0_38 = arith.constant 0 : index
      %122 = arith.index_cast %44 : i32 to index
      %123 = vector.load %arg11[%c0_38, %122] : memref<16x2816xbf16, #tpu.memory_space<vmem>>, vector<16x256xbf16>
      tpu.vector_store %arg11[%c0_38, %122], %121 {strides = array<i32>} : memref<16x2816xbf16, #tpu.memory_space<vmem>>, vector<16x256xbf16>,
    }
    %c11_i32_3 = arith.constant 11 : i32
    %c0_4 = arith.constant 0 : index
    %c0_5 = arith.constant 0 : index
    %3 = vector.load %arg4[%c0_4, %c0_5] : memref<16x144xbf16, #tpu.memory_space<vmem>>, vector<16x144xbf16>
    %c0_6 = arith.constant 0 : index
    %c0_7 = arith.constant 0 : index
    %4 = vector.load %arg5[%c0_6, %c0_7] : memref<16x1xf32, #tpu.memory_space<vmem>>, vector<16x1xf32>
    %c0_i32_8 = arith.constant 0 : i32
    %c10_i32 = arith.constant 10 : i32
    %5 = arith.addi %c0_i32_8, %c10_i32 : i32
    %c1_i32_9 = arith.constant 1 : i32
    scf.for %arg13 = %c0_i32_8 to %5 step %c1_i32_9  : i32 {
      %c256_i32 = arith.constant 256 : i32
      %43 = arith.muli %arg13, %c256_i32 : i32
      %44 = tpu.assume_multiple %43, 256 : i32
      %c0_30 = arith.constant 0 : index
      %45 = arith.index_cast %44 : i32 to index
      %46 = vector.load %arg11[%c0_30, %45] : memref<16x2816xbf16, #tpu.memory_space<vmem>>, vector<16x384xbf16>
      %47 = vector.extract_strided_slice %46 {offsets = [0, 0], sizes = [16, 256], strides = [1, 1]} : vector<16x384xbf16> to vector<16x256xbf16>
      %48 = vector.extract_strided_slice %46 {offsets = [0, 1], sizes = [16, 256], strides = [1, 1]} : vector<16x384xbf16> to vector<16x256xbf16>
      %49 = vector.extract_strided_slice %46 {offsets = [0, 2], sizes = [16, 256], strides = [1, 1]} : vector<16x384xbf16> to vector<16x256xbf16>
      %50 = vector.extract_strided_slice %46 {offsets = [0, 49], sizes = [16, 256], strides = [1, 1]} : vector<16x384xbf16> to vector<16x256xbf16>
      %51 = vector.extract_strided_slice %46 {offsets = [0, 50], sizes = [16, 256], strides = [1, 1]} : vector<16x384xbf16> to vector<16x256xbf16>
      %52 = vector.extract_strided_slice %46 {offsets = [0, 51], sizes = [16, 256], strides = [1, 1]} : vector<16x384xbf16> to vector<16x256xbf16>
      %53 = vector.extract_strided_slice %46 {offsets = [0, 98], sizes = [16, 256], strides = [1, 1]} : vector<16x384xbf16> to vector<16x256xbf16>
      %54 = vector.extract_strided_slice %46 {offsets = [0, 99], sizes = [16, 256], strides = [1, 1]} : vector<16x384xbf16> to vector<16x256xbf16>
      %55 = vector.extract_strided_slice %46 {offsets = [0, 100], sizes = [16, 256], strides = [1, 1]} : vector<16x384xbf16> to vector<16x256xbf16>
      %56 = tpu.concatenate %47, %48, %49, %50, %51, %52, %53, %54, %55 in 0 : vector<16x256xbf16>, vector<16x256xbf16>, vector<16x256xbf16>, vector<16x256xbf16>, vector<16x256xbf16>, vector<16x256xbf16>, vector<16x256xbf16>, vector<16x256xbf16>, vector<16x256xbf16> -> vector<144x256xbf16>
      %cst_31 = arith.constant dense<0.000000e+00> : vector<16x256xf32>
      %57 = tpu.matmul %3, %56, %cst_31 {dimension_numbers = #tpu.dot_dimension_numbers<[1], [0], [0], [1], [0, 0, 1, 1], [], []>} : vector<16x144xbf16>, vector<144x256xbf16>, vector<16x256xf32> -> vector<16x256xf32>
      %58 = vector.broadcast %4 : vector<16x1xf32> to vector<16x256xf32>
      %59 = arith.addf %57, %58 : vector<16x256xf32>
      %60 = math.absf %59 : vector<16x256xf32>
      %cst_32 = arith.constant 0.000000e+00 : f32
      %61 = vector.broadcast %cst_32 : f32 to vector<16x256xf32>
      %62 = arith.subf %61, %60 : vector<16x256xf32>
      %63 = math.exp %62 : vector<16x256xf32>
      %cst_33 = arith.constant 0.000000e+00 : f32
      %64 = vector.broadcast %cst_33 : f32 to vector<16x256xf32>
      %65 = arith.maximumf %59, %64 : vector<16x256xf32>
      %cst_34 = arith.constant 1.000000e+00 : f32
      %66 = vector.broadcast %cst_34 : f32 to vector<16x256xf32>
      %67 = arith.addf %66, %63 : vector<16x256xf32>
      %68 = math.log %67 : vector<16x256xf32>
      %69 = arith.addf %65, %68 : vector<16x256xf32>
      %cst_35 = arith.constant -8.000000e+00 : f32
      %70 = vector.broadcast %cst_35 : f32 to vector<16x256xf32>
      %71 = arith.cmpf olt, %59, %70 : vector<16x256xf32>
      %72 = arith.select %71, %63, %69 : vector<16x256xi1>, vector<16x256xf32>
      %cst_36 = arith.constant 2.000000e+01 : f32
      %73 = vector.broadcast %cst_36 : f32 to vector<16x256xf32>
      %74 = arith.cmpf ogt, %59, %73 : vector<16x256xf32>
      %75 = arith.select %74, %59, %72 : vector<16x256xi1>, vector<16x256xf32>
      %76 = arith.truncf %75 : vector<16x256xf32> to vector<16x256xbf16>
      %c0_37 = arith.constant 0 : index
      %77 = arith.index_cast %44 : i32 to index
      %78 = vector.load %arg12[%c0_37, %77] : memref<16x2560xbf16, #tpu.memory_space<vmem>>, vector<16x256xbf16>
      tpu.vector_store %arg12[%c0_37, %77], %76 {strides = array<i32>} : memref<16x2560xbf16, #tpu.memory_space<vmem>>, vector<16x256xbf16>,
    }
    %c10_i32_10 = arith.constant 10 : i32
    %c0_11 = arith.constant 0 : index
    %c0_12 = arith.constant 0 : index
    %6 = vector.load %arg6[%c0_11, %c0_12] : memref<16x144xbf16, #tpu.memory_space<vmem>>, vector<16x144xbf16>
    %c0_13 = arith.constant 0 : index
    %c0_14 = arith.constant 0 : index
    %7 = vector.load %arg7[%c0_13, %c0_14] : memref<16x1xf32, #tpu.memory_space<vmem>>, vector<16x1xf32>
    %cst = arith.constant 0.000000e+00 : f32
    %8 = vector.broadcast %cst : f32 to vector<16x32xf32>
    %c0_i32_15 = arith.constant 0 : i32
    %c9_i32 = arith.constant 9 : i32
    %9 = arith.addi %c0_i32_15, %c9_i32 : i32
    %c1_i32_16 = arith.constant 1 : i32
    %10 = scf.for %arg13 = %c0_i32_15 to %9 step %c1_i32_16 iter_args(%arg14 = %8) -> (vector<16x32xf32>)  : i32 {
      %c256_i32 = arith.constant 256 : i32
      %43 = arith.muli %arg13, %c256_i32 : i32
      %44 = tpu.assume_multiple %43, 256 : i32
      %c0_30 = arith.constant 0 : index
      %45 = arith.index_cast %44 : i32 to index
      %46 = vector.load %arg12[%c0_30, %45] : memref<16x2560xbf16, #tpu.memory_space<vmem>>, vector<16x384xbf16>
      %47 = vector.extract_strided_slice %46 {offsets = [0, 0], sizes = [16, 256], strides = [1, 1]} : vector<16x384xbf16> to vector<16x256xbf16>
      %48 = vector.extract_strided_slice %46 {offsets = [0, 1], sizes = [16, 256], strides = [1, 1]} : vector<16x384xbf16> to vector<16x256xbf16>
      %49 = vector.extract_strided_slice %46 {offsets = [0, 2], sizes = [16, 256], strides = [1, 1]} : vector<16x384xbf16> to vector<16x256xbf16>
      %50 = vector.extract_strided_slice %46 {offsets = [0, 49], sizes = [16, 256], strides = [1, 1]} : vector<16x384xbf16> to vector<16x256xbf16>
      %51 = vector.extract_strided_slice %46 {offsets = [0, 50], sizes = [16, 256], strides = [1, 1]} : vector<16x384xbf16> to vector<16x256xbf16>
      %52 = vector.extract_strided_slice %46 {offsets = [0, 51], sizes = [16, 256], strides = [1, 1]} : vector<16x384xbf16> to vector<16x256xbf16>
      %53 = vector.extract_strided_slice %46 {offsets = [0, 98], sizes = [16, 256], strides = [1, 1]} : vector<16x384xbf16> to vector<16x256xbf16>
      %54 = vector.extract_strided_slice %46 {offsets = [0, 99], sizes = [16, 256], strides = [1, 1]} : vector<16x384xbf16> to vector<16x256xbf16>
      %55 = vector.extract_strided_slice %46 {offsets = [0, 100], sizes = [16, 256], strides = [1, 1]} : vector<16x384xbf16> to vector<16x256xbf16>
      %56 = tpu.concatenate %47, %48, %49, %50, %51, %52, %53, %54, %55 in 0 : vector<16x256xbf16>, vector<16x256xbf16>, vector<16x256xbf16>, vector<16x256xbf16>, vector<16x256xbf16>, vector<16x256xbf16>, vector<16x256xbf16>, vector<16x256xbf16>, vector<16x256xbf16> -> vector<144x256xbf16>
      %cst_31 = arith.constant dense<0.000000e+00> : vector<16x256xf32>
      %57 = tpu.matmul %6, %56, %cst_31 {dimension_numbers = #tpu.dot_dimension_numbers<[1], [0], [0], [1], [0, 0, 1, 1], [], []>} : vector<16x144xbf16>, vector<144x256xbf16>, vector<16x256xf32> -> vector<16x256xf32>
      %58 = vector.broadcast %7 : vector<16x1xf32> to vector<16x256xf32>
      %59 = arith.addf %57, %58 : vector<16x256xf32>
      %60 = math.absf %59 : vector<16x256xf32>
      %cst_32 = arith.constant 0.000000e+00 : f32
      %61 = vector.broadcast %cst_32 : f32 to vector<16x256xf32>
      %62 = arith.subf %61, %60 : vector<16x256xf32>
      %63 = math.exp %62 : vector<16x256xf32>
      %cst_33 = arith.constant 0.000000e+00 : f32
      %64 = vector.broadcast %cst_33 : f32 to vector<16x256xf32>
      %65 = arith.maximumf %59, %64 : vector<16x256xf32>
      %cst_34 = arith.constant 1.000000e+00 : f32
      %66 = vector.broadcast %cst_34 : f32 to vector<16x256xf32>
      %67 = arith.addf %66, %63 : vector<16x256xf32>
      %68 = math.log %67 : vector<16x256xf32>
      %69 = arith.addf %65, %68 : vector<16x256xf32>
      %cst_35 = arith.constant -8.000000e+00 : f32
      %70 = vector.broadcast %cst_35 : f32 to vector<16x256xf32>
      %71 = arith.cmpf olt, %59, %70 : vector<16x256xf32>
      %72 = arith.select %71, %63, %69 : vector<16x256xi1>, vector<16x256xf32>
      %cst_36 = arith.constant 2.000000e+01 : f32
      %73 = vector.broadcast %cst_36 : f32 to vector<16x256xf32>
      %74 = arith.cmpf ogt, %59, %73 : vector<16x256xf32>
      %75 = arith.select %74, %59, %72 : vector<16x256xi1>, vector<16x256xf32>
      %76 = arith.index_cast %44 : i32 to index
      %c0_37 = arith.constant 0 : index
      %77 = vector.load %arg8[%76, %c0_37] : memref<2304x32xbf16, #tpu.memory_space<vmem>>, vector<256x32xbf16>
      %78 = arith.truncf %75 : vector<16x256xf32> to vector<16x256xbf16>
      %cst_38 = arith.constant dense<0.000000e+00> : vector<16x32xf32>
      %79 = tpu.matmul %78, %77, %cst_38 {dimension_numbers = #tpu.dot_dimension_numbers<[1], [0], [0], [1], [0, 0, 1, 1], [], []>} : vector<16x256xbf16>, vector<256x32xbf16>, vector<16x32xf32> -> vector<16x32xf32>
      %80 = arith.addf %arg14, %79 : vector<16x32xf32>
      scf.yield %80 : vector<16x32xf32>
    }
    %c9_i32_17 = arith.constant 9 : i32
    %11 = tpu.iota {dimensions = array<i32: 0>} : vector<16x32xi32>
    %12 = tpu.iota {dimensions = array<i32: 1>} : vector<16x32xi32>
    %c15_i32 = arith.constant 15 : i32
    %13 = vector.broadcast %c15_i32 : i32 to vector<16x32xi32>
    %14 = arith.andi %12, %13 : vector<16x32xi32>
    %15 = arith.cmpi eq, %14, %11 : vector<16x32xi32>
    %cst_18 = arith.constant 0.000000e+00 : f32
    %16 = vector.broadcast %cst_18 : f32 to vector<16x32xf32>
    %17 = arith.select %15, %10, %16 : vector<16x32xi1>, vector<16x32xf32>
    %cst_19 = arith.constant dense<0.000000e+00> : vector<32xf32>
    %18 = vector.multi_reduction <add>, %17, %cst_19 [0] : vector<16x32xf32> to vector<32xf32>
    %19 = vector.shape_cast %18 : vector<32xf32> to vector<1x32xf32>
    %20 = vector.extract_strided_slice %19 {offsets = [0, 0], sizes = [1, 16], strides = [1, 1]} : vector<1x32xf32> to vector<1x16xf32>
    %cst_20 = arith.constant dense<0.000000e+00> : vector<1xf32>
    %21 = vector.multi_reduction <add>, %20, %cst_20 [1] : vector<1x16xf32> to vector<1xf32>
    %22 = vector.shape_cast %21 : vector<1xf32> to vector<1x1xf32>
    %23 = vector.extract_strided_slice %19 {offsets = [0, 16], sizes = [1, 16], strides = [1, 1]} : vector<1x32xf32> to vector<1x16xf32>
    %cst_21 = arith.constant dense<0.000000e+00> : vector<1xf32>
    %24 = vector.multi_reduction <add>, %23, %cst_21 [1] : vector<1x16xf32> to vector<1xf32>
    %25 = vector.shape_cast %24 : vector<1xf32> to vector<1x1xf32>
    %26 = tpu.iota {dimensions = array<i32: 1>} : vector<1x128xi32>
    %c0_i32_22 = arith.constant 0 : i32
    %27 = vector.broadcast %c0_i32_22 : i32 to vector<1x128xi32>
    %28 = arith.cmpi eq, %26, %27 : vector<1x128xi32>
    %c1_i32_23 = arith.constant 1 : i32
    %29 = vector.broadcast %c1_i32_23 : i32 to vector<1x128xi32>
    %30 = arith.cmpi eq, %26, %29 : vector<1x128xi32>
    %cst_24 = arith.constant 0.000000e+00 : f32
    %31 = vector.shape_cast %25 : vector<1x1xf32> to vector<1x1xf32>
    %32 = vector.broadcast %31 : vector<1x1xf32> to vector<1x128xf32>
    %33 = vector.broadcast %cst_24 : f32 to vector<1x128xf32>
    %34 = arith.select %30, %32, %33 : vector<1x128xi1>, vector<1x128xf32>
    %35 = vector.shape_cast %22 : vector<1x1xf32> to vector<1x1xf32>
    %36 = vector.broadcast %35 : vector<1x1xf32> to vector<1x128xf32>
    %37 = arith.select %28, %36, %34 : vector<1x128xi1>, vector<1x128xf32>
    %c0_25 = arith.constant 0 : index
    %c0_26 = arith.constant 0 : index
    %38 = vector.load %arg9[%c0_25, %c0_26] : memref<1x128xf32, #tpu.memory_space<vmem>>, vector<1x128xf32>
    %39 = arith.addf %37, %38 : vector<1x128xf32>
    %c0_27 = arith.constant 0 : index
    %c0_28 = arith.constant 0 : index
    %c0_29 = arith.constant 0 : index
    %40 = vector.load %arg10[%c0_27, %c0_28, %c0_29] : memref<1x1x128xf32, #tpu.memory_space<vmem>>, vector<1x1x128xf32>
    %41 = vector.shape_cast %40 : vector<1x1x128xf32> to vector<1x128xf32>
    %42 = vector.shape_cast %39 : vector<1x128xf32> to vector<1x1x128xf32>
    tpu.vector_store %arg10[%c0_27, %c0_28, %c0_29], %42 {strides = array<i32>} : memref<1x1x128xf32, #tpu.memory_space<vmem>>, vector<1x1x128xf32>,
    return
  }
  func.func @transform_0(%arg0: i32) -> (i32, i32, i32) {
    %c0_i32 = arith.constant 0 : i32
    %c0_i32_0 = arith.constant 0 : i32
    %c0_i32_1 = arith.constant 0 : i32
    return %arg0, %c0_i32, %c0_i32_0 : i32, i32, i32
  }
  func.func @transform_1(%arg0: i32) -> (i32, i32) {
    %c0_i32 = arith.constant 0 : i32
    %c0_i32_0 = arith.constant 0 : i32
    %c0_i32_1 = arith.constant 0 : i32
    return %c0_i32, %c0_i32_0 : i32, i32
  }
  func.func @transform_2(%arg0: i32) -> (i32, i32) {
    %c0_i32 = arith.constant 0 : i32
    %c0_i32_0 = arith.constant 0 : i32
    %c0_i32_1 = arith.constant 0 : i32
    return %c0_i32, %c0_i32_0 : i32, i32
  }
  func.func @transform_3(%arg0: i32) -> (i32, i32) {
    %c0_i32 = arith.constant 0 : i32
    %c0_i32_0 = arith.constant 0 : i32
    %c0_i32_1 = arith.constant 0 : i32
    return %c0_i32, %c0_i32_0 : i32, i32
  }
  func.func @transform_4(%arg0: i32) -> (i32, i32) {
    %c0_i32 = arith.constant 0 : i32
    %c0_i32_0 = arith.constant 0 : i32
    %c0_i32_1 = arith.constant 0 : i32
    return %c0_i32, %c0_i32_0 : i32, i32
  }
  func.func @transform_5(%arg0: i32) -> (i32, i32) {
    %c0_i32 = arith.constant 0 : i32
    %c0_i32_0 = arith.constant 0 : i32
    %c0_i32_1 = arith.constant 0 : i32
    return %c0_i32, %c0_i32_0 : i32, i32
  }
  func.func @transform_6(%arg0: i32) -> (i32, i32) {
    %c0_i32 = arith.constant 0 : i32
    %c0_i32_0 = arith.constant 0 : i32
    %c0_i32_1 = arith.constant 0 : i32
    return %c0_i32, %c0_i32_0 : i32, i32
  }
  func.func @transform_7(%arg0: i32) -> (i32, i32) {
    %c0_i32 = arith.constant 0 : i32
    %c0_i32_0 = arith.constant 0 : i32
    %c0_i32_1 = arith.constant 0 : i32
    return %c0_i32, %c0_i32_0 : i32, i32
  }
  func.func @transform_8(%arg0: i32) -> (i32, i32) {
    %c0_i32 = arith.constant 0 : i32
    %c0_i32_0 = arith.constant 0 : i32
    %c0_i32_1 = arith.constant 0 : i32
    return %c0_i32, %c0_i32_0 : i32, i32
  }
  func.func @transform_9(%arg0: i32) -> (i32, i32, i32) {
    %c0_i32 = arith.constant 0 : i32
    %c0_i32_0 = arith.constant 0 : i32
    %c0_i32_1 = arith.constant 0 : i32
    return %arg0, %c0_i32, %c0_i32_0 : i32, i32, i32
  }
}

</mosaic_0001>

<bundles_post_ra>
// kernel: drama_forward.1
= control target key start
LH: loop header
LB: loop body
LE: loop exit
PB: predicated region body
PF: predicated region fallthrough
CT: control target
= control target key end

     0   :  { %s2523_s0 = inlined_call_operand.vmem [shape: f32[2,1,2944], index: 0, kind: input, shape index: {}]   ;;  %s2524_s1 = inlined_call_operand.vmem [shape: f32[16,9], index: 1, kind: input, shape index: {}]   ;;  %s2525_s2 = inlined_call_operand.vmem [shape: f32[16,1], index: 2, kind: input, shape index: {}]   ;;  %s2526_s3 = inlined_call_operand.vmem [shape: bf16[16,144], index: 3, kind: input, shape index: {}]   ;;  %s2527_s4 = inlined_call_operand.vmem [shape: f32[16,1], index: 4, kind: input, shape index: {}]   ;;  %s2528_s5 = inlined_call_operand.vmem [shape: bf16[16,144], index: 5, kind: input, shape index: {}]   ;;  %s2529_s6 = inlined_call_operand.vmem [shape: f32[16,1], index: 6, kind: input, shape index: {}]   ;;  %s2530_s7 = inlined_call_operand.vmem [shape: bf16[2304,32], index: 7, kind: input, shape index: {}]   ;;  %s2531_s8 = inlined_call_operand.vmem [shape: f32[1,128], index: 8, kind: input, shape index: {}]   ;;  %s2532_s9 = inlined_call_operand.hbm [shape: f32[2,1,128], index: 9, kind: output, shape index: {}]  }
   0x1   :  { %2535 = sst [smem:[#allocation7_spill]] %s2523_s0 }
   0x2   :  { %14 = vsyncpa [#allocation5], 0 }
   0x3   :  { %16 = vsyncpa [#allocation5 + $0x1], 0  ;;  %s2034_s30 = smov 0   ;;  %s2036_s10 = smov 0  }
   0x4   :  { %s2038_s11 = smov 0   ;;  %s2040_s12 = smov 0  }
   0x5 LB: > { %s2055_s13 = sadd.s32 4294967295, %s1925_s12   ;;  %s1586_s14 = sadd.s32 4294967294, %s1925_s12   ;;  %s1925_s12 = sphi %s2040_s12, %s2548_s12   ;;  %s1921_s11 = sphi %s2038_s11, %s2547_s11   ;;  %s1917_s10 = sphi %s2036_s10, %s2546_s10   ;;  %s1913_s30 = sphi %s2034_s30, %s2545_s30  }
   0x6   : > { %s2059_s15 = sadd.s32 1, %s1925_s12   ;;  %s223_s16 = sadd.s32 1, %s1921_s11 }
   0x7   : > { %s220_s17 = ssub.s32 %s1925_s12, %s2059_s15  ;;  %p233_p0 = scmp.ne.s32.totalorder %s1921_s11, %s1917_s10 }
   0x8   : > { %p221_p1 = scmp.eq.s32.totalorder %s220_s17, 0  ;;  %p234_p2 = scmp.eq.s32.totalorder %s2055_s13, 1 }
   0x9   : > { %p239_p3 = scmp.ne.s32.totalorder %s1917_s10, %s1913_s30  ;;  %p240_p4 = scmp.eq.s32.totalorder %s1586_s14, 1 }
   0xa   : > { %s2070_s18 = scalar_select %p221_p1, %s1921_s11, %s223_s16  }
   0xb   : > { %p2072_p5 = por %p234_p2, %p233_p0  ;;  %p2076_p6 = por %p240_p4, %p239_p3 }
   0xc   : > { %p1589_p7 = scmp.ge.s32.totalorder %s1925_s12, 1  ;;  %p289_p8 = scmp.lt.s32.totalorder %s1925_s12, 3 }
   0xe   : > { %p290_p9 = pnand %p1589_p7, %p289_p8 }
   0xf   : > { %s2534_s21 = sand.u32 (!%p290_p9), 1, %s1917_s10   ;;  %p323_p10 = scmp.lt.s32.totalorder (!%p290_p9), %s2055_s13, 1  ;;  %v2087_v0 = vld [vmem:[%s2524_s1] sm:$0xff] (!%p290_p9)  ;;  %v2092_v1 = vld [vmem:[%s2524_s1 + $0x8] sm:$0xff] (!%p290_p9) }
  0x10   : > { %293 = sbr.rel (%p290_p9) target bundleno = 1777 (0x6f1), region = 56  ;;  %v2097_v2 = vld [vmem:[%s2525_s2] sm:$0xff] (!%p290_p9)  ;;  %v2102_v3 = vld [vmem:[%s2525_s2 + $0x8] sm:$0xff] (!%p290_p9)  ;;  %s2538_s0 = sld [smem:[#allocation7_spill]] (!%p290_p9) }
  0x11   : > { %s2112_s24 = scalar_lea.vmem (!%p290_p9), [#allocation4], %s2534_s21  ;;  %s2114_s25 = smov (!%p290_p9), 0  }
  0x17   : > { %s324_s14 = scalar_select %p323_p10, %s2055_s13, 1 }
  0x19   : > { %s1645_s16 = smul.u32 23, %s324_s14 }
  0x1b   : > { %s2108_s23 = scalar_lea.vmem %s2538_s0, %s1645_s16 }
  0x1c LB: >> { %v1947_v4 = vmov 1   ;;  %v1948_v5 = vmov 2   ;;  %v1949_v6 = vmov 3   ;;  %v1950_v7 = vmov 4   ;;  %s1590_s26 = sshll.u32 %s1929_s25, 8  ;;  %s1956_s29 = smov 127   ;;  %s1929_s25 = sphi %s2114_s25, %s337_s25  }
  0x1d   : >> { %1761 = vset.pattern.permute.xlu0 %v1947_v4  ;;  %1762 = vset.pattern.permute.xlu1 %v1948_v5  ;;  %v1951_v8 = vmov 5   ;;  %v1952_v9 = vmov 6   ;;  %v1953_v10 = vmov 7   ;;  %v1954_v11 = vmov 0   ;;  %s2140_s27 = sshra.s32 %s1590_s26, 7  ;;  %s1957_s14 = smov 126  }
  0x1e   : >> { %373 = vperm.xlu0 %1761, %v2087_v0   ;;  %423 = vperm.xlu1 %1762, %v2087_v0   ;;  %v1955_v12 = vmov 8   ;;  %v354_v13 = vlaneseq  ;;  %s341_s28 = scalar_lea.vmem %s2108_s23, %s2140_s27  ;;  %s1958_s16 = smov 79   ;;  %vm409_vm0 = vcmask 1039360   ;;  %vm454_vm1 = vcmask 1031168  }
  0x1f   : >> { %v342_v17 = vld [vmem:[%s341_s28] sm:$0x7]  ;;  %s1959_s17 = smov 78   ;;  %s1960_s22 = smov 77   ;;  %vm499_vm2 = vcmask 646144   ;;  %vm544_vm3 = vcmask 637952  }
  0x20   : >> { %v2143_v14 = vshrl.u32 %v354_v13, 7  ;;  %s1961_s26 = smov 30   ;;  %s1962_s28 = smov 29   ;;  %vm589_vm4 = vcmask 629760   ;;  %vm634_vm5 = vcmask 244736   ;;  %vm679_vm6 = vcmask 236544  }
  0x21   : >> { %vm2533_vm7 = vcmask 228352   ;;  %s337_s25 = sadd.s32 1, %s1929_s25  }
  0x22   : >> { %377 = vperm.xlu0 %1761, %v2092_v1   ;;  %427 = vperm.xlu1 %1762, %v2092_v1   ;;  %v356_v15 = vsub.s32 0, %v2143_v14  ;;  %v360_v16 = vsub.s32 1, %v2143_v14  ;;  %v382_v20 = vsub.s32 2, %v2143_v14  ;;  %p334_p11 = scmp.ge.s32.totalorder %s337_s25, 11  }
  0x23   : > { %s2309_s23 = smov (%p334_p11), 0  }
  0x24   : >> { %v2149_v18 = vrot.slane %v342_v17, %v356_v15  ;;  %v2151_v19 = vrot.slane %v342_v17, %v360_v16  ;;  %v2154_v22 = vrot.slane %v342_v17, %v382_v20 }
  0x26   : >> { %1763 = vset.pattern.permute.xlu0 %v1949_v6  ;;  %1764 = vset.pattern.permute.xlu1 %v1949_v6 }
  0x27   : >> { %468 = vperm.xlu0 %1763, %v2087_v0   ;;  %472 = vperm.xlu1 %1764, %v2092_v1  }
  0x2b   : >> { %1765 = vset.pattern.permute.xlu1 %v1950_v7  ;;  %1766 = vset.pattern.permute.xlu0 %v1950_v7 }
  0x2c   : >> { %513 = vperm.xlu1 %1765, %v2087_v0   ;;  %517 = vperm.xlu0 %1766, %v2092_v1  }
  0x30   : >> { %1767 = vset.pattern.permute.xlu1 %v1951_v8  ;;  %1768 = vset.pattern.permute.xlu0 %v1952_v9 }
  0x31   : >> { %558 = vperm.xlu1 %1767, %v2087_v0   ;;  %603 = vperm.xlu0 %1768, %v2087_v0  }
  0x35   : >> { %562 = vperm.xlu1 %1767, %v2092_v1   ;;  %1771 = vset.pattern.permute.xlu0 %v1953_v10 }
  0x36   : >> { %652 = vperm.xlu0 %1771, %v2092_v1  }
  0x39   : >> { %1769 = vset.pattern.permute.xlu1 %v1952_v9 }
  0x3a   : >> { %607 = vperm.xlu1 %1769, %v2092_v1   ;;  %1773 = vset.pattern.permute.xlu0 %v1954_v11 }
  0x3b   : >> { %345 = vperm.xlu0 %1773, %v2087_v0  }
  0x3e   : >> { %1770 = vset.pattern.permute.xlu1 %v1953_v10 }
  0x3f   : >> { %648 = vperm.xlu1 %1770, %v2087_v0   ;;  %744 = vperm.xlu0 %1773, %v2102_v3  }
  0x43   : >> { %1772 = vset.pattern.permute.xlu1 %v1955_v12 }
  0x44   : >> { %693 = vperm.xlu1 %1772, %v2087_v0  }
  0x48   : >> { %697 = vperm.xlu1 %1772, %v2092_v1  }
  0x4c   : >> { %1774 = vset.pattern.permute.xlu1 %v1954_v11 }
  0x4d   : >> { %350 = vperm.xlu1 %1774, %v2092_v1  }
  0x51   : >> { %739 = vperm.xlu1 %1774, %v2097_v2  }
  0x9d   : >> { %v374_v21 = vpop.permute.xlu0 %373  ;;  %v424_v25 = vpop.permute.xlu1 %423 }
  0x9e   : >> { %v385_v23 = vmul.f32 %v374_v21, %v2149_v18  ;;  %v386_v24 = vmul.f32 %v374_v21, %v2151_v19  ;;  %v387_v27 = vmul.f32 %v2154_v22, %v374_v21  ;;  %v430_v32 = vmul.f32 %v424_v25, %v2149_v18 }
  0x9f   : >> { %v431_v33 = vmul.f32 %v424_v25, %v2151_v19  ;;  %v432_v37 = vmul.f32 %v424_v25, %v2154_v22 }
  0xa0   : >> { %399 = vrot.lane.b32.xlu0 %v386_v24, %s1956_s29  ;;  %397 = vrot.lane.b32.xlu1 %v385_v23, %s1956_s29 }
  0xa1   : >> { %v378_v26 = vpop.permute.xlu0 %377  ;;  %v428_v29 = vpop.permute.xlu1 %427 }
  0xa2   : >> { %v388_v28 = vmul.f32 %v378_v26, %v2149_v18  ;;  %v389_v30 = vmul.f32 %v378_v26, %v2151_v19  ;;  %v390_v31 = vmul.f32 %v2154_v22, %v378_v26  ;;  %v433_v38 = vmul.f32 %v428_v29, %v2149_v18 }
  0xa3   : >> { %v434_v41 = vmul.f32 %v428_v29, %v2151_v19  ;;  %v435_v42 = vmul.f32 %v428_v29, %v2154_v22 }
  0xa4   : >> { %403 = vrot.lane.b32.xlu0 %v388_v28, %s1956_s29  ;;  %401 = vrot.lane.b32.xlu1 %v387_v27, %s1956_s29 }
  0xa6   : >> { %v473_v34 = vpop.permute.xlu1 %472  ;;  %v469_v35 = vpop.permute.xlu0 %468 }
  0xa7   : >> { %v475_v44 = vmul.f32 %v469_v35, %v2149_v18  ;;  %v476_v45 = vmul.f32 %v469_v35, %v2151_v19  ;;  %v478_v48 = vmul.f32 %v473_v34, %v2149_v18  ;;  %v477_v49 = vmul.f32 %v469_v35, %v2154_v22 }
  0xa8   : >> { %407 = vrot.lane.b32.xlu0 %v390_v31, %s1956_s29  ;;  %405 = vrot.lane.b32.xlu1 %v389_v30, %s1956_s29  ;;  %v479_v54 = vmul.f32 %v473_v34, %v2151_v19  ;;  %v480_v55 = vmul.f32 %v473_v34, %v2154_v22  ;;  %s1963_s29 = smov 28  }
  0xab   : >> { %v514_v36 = vpop.permute.xlu1 %513  ;;  %v518_v39 = vpop.permute.xlu0 %517 }
  0xac   : >> { %444 = vrot.lane.b32.xlu0 %v431_v33, %s1957_s14  ;;  %442 = vrot.lane.b32.xlu1 %v430_v32, %s1957_s14  ;;  %v520_v57 = vmul.f32 %v514_v36, %v2149_v18  ;;  %v521_v58 = vmul.f32 %v514_v36, %v2151_v19  ;;  %v523_v60 = vmul.f32 %v518_v39, %v2149_v18 }
  0xad   : >> { %v522_v61 = vmul.f32 %v514_v36, %v2154_v22  ;;  %v524_v63 = vmul.f32 %v518_v39, %v2151_v19  ;;  %v525_v4 = vmul.f32 %v518_v39, %v2154_v22 }
  0xb0   : >> { %448 = vrot.lane.b32.xlu0 %v433_v38, %s1957_s14  ;;  %446 = vrot.lane.b32.xlu1 %v432_v37, %s1957_s14  ;;  %v559_v40 = vpop.permute.xlu1 %558  ;;  %v604_v43 = vpop.permute.xlu0 %603 }
  0xb1   : >> { %v565_v5 = vmul.f32 %v559_v40, %v2149_v18  ;;  %v566_v6 = vmul.f32 %v559_v40, %v2151_v19  ;;  %v567_v10 = vmul.f32 %v559_v40, %v2154_v22  ;;  %v610_v16 = vmul.f32 %v604_v43, %v2149_v18 }
  0xb2   : >> { %v611_v17 = vmul.f32 %v604_v43, %v2151_v19  ;;  %v612_v21 = vmul.f32 %v604_v43, %v2154_v22 }
  0xb4   : >> { %452 = vrot.lane.b32.xlu0 %v435_v42, %s1957_s14  ;;  %450 = vrot.lane.b32.xlu1 %v434_v41, %s1957_s14  ;;  %v563_v47 = vpop.permute.xlu1 %562  ;;  %s1591_s14 = sshll.u32 %s2140_s27, 3 }
  0xb5   : >> { %v2170_v46 = vpop.permute.xlu0 %652  ;;  %v568_v11 = vmul.f32 %v563_v47, %v2149_v18  ;;  %v569_v12 = vmul.f32 %v563_v47, %v2151_v19  ;;  %v570_v15 = vmul.f32 %v563_v47, %v2154_v22  ;;  %s806_s27 = scalar_lea.vmem [#allocation2], %s1591_s14 }
  0xb6   : >> { %v658_v27 = vmul.f32 %v2170_v46, %v2149_v18  ;;  %v659_v29 = vmul.f32 %v2170_v46, %v2151_v19  ;;  %v660_v30 = vmul.f32 %v2170_v46, %v2154_v22 }
  0xb8   : >> { %489 = vrot.lane.b32.xlu0 %v476_v45, %s1958_s16  ;;  %487 = vrot.lane.b32.xlu1 %v475_v44, %s1958_s16 }
  0xb9   : >> { %v608_v51 = vpop.permute.xlu1 %607 }
  0xba   : >> { %v346_v50 = vpop.permute.xlu0 %345  ;;  %v613_v20 = vmul.f32 %v608_v51, %v2149_v18  ;;  %v614_v23 = vmul.f32 %v608_v51, %v2151_v19  ;;  %v615_v24 = vmul.f32 %v608_v51, %v2154_v22 }
  0xbb   : >> { %v2175_v52 = vmul.f32 %v2149_v18, %v346_v50  ;;  %v2178_v53 = vmul.f32 %v2151_v19, %v346_v50 }
  0xbc   : >> { %493 = vrot.lane.b32.xlu0 %v478_v48, %s1958_s16  ;;  %491 = vrot.lane.b32.xlu1 %v477_v49, %s1958_s16 }
  0xbe   : >> { %v649_v56 = vpop.permute.xlu1 %648  ;;  %v2223_v38 = vpop.permute.xlu0 %744 }
  0xbf   : >> { %v655_v25 = vmul.f32 %v649_v56, %v2149_v18  ;;  %v656_v26 = vmul.f32 %v649_v56, %v2151_v19  ;;  %v657_v28 = vmul.f32 %v649_v56, %v2154_v22 }
  0xc0   : >> { %497 = vrot.lane.b32.xlu0 %v480_v55, %s1958_s16  ;;  %495 = vrot.lane.b32.xlu1 %v479_v54, %s1958_s16 }
  0xc3   : >> { %v694_v59 = vpop.permute.xlu1 %693 }
  0xc4   : >> { %534 = vrot.lane.b32.xlu0 %v521_v58, %s1959_s17  ;;  %532 = vrot.lane.b32.xlu1 %v520_v57, %s1959_s17  ;;  %v700_v31 = vmul.f32 %v694_v59, %v2149_v18  ;;  %v701_v32 = vmul.f32 %v694_v59, %v2151_v19  ;;  %v702_v33 = vmul.f32 %v694_v59, %v2154_v22 }
  0xc7   : >> { %v698_v62 = vpop.permute.xlu1 %697 }
  0xc8   : >> { %538 = vrot.lane.b32.xlu0 %v523_v60, %s1959_s17  ;;  %536 = vrot.lane.b32.xlu1 %v522_v61, %s1959_s17  ;;  %v703_v34 = vmul.f32 %v698_v62, %v2149_v18  ;;  %v704_v35 = vmul.f32 %v698_v62, %v2151_v19  ;;  %v705_v36 = vmul.f32 %v698_v62, %v2154_v22 }
  0xcc   : >> { %542 = vrot.lane.b32.xlu0 %v525_v4, %s1959_s17  ;;  %540 = vrot.lane.b32.xlu1 %v524_v63, %s1959_s17  ;;  %v351_v7 = vpop.permute.xlu1 %350 }
  0xcd   : >> { %v2191_v8 = vmul.f32 %v2149_v18, %v351_v7  ;;  %v2194_v9 = vmul.f32 %v2151_v19, %v351_v7 }
  0xd0   : >> { %579 = vrot.lane.b32.xlu0 %v566_v6, %s1960_s22  ;;  %577 = vrot.lane.b32.xlu1 %v565_v5, %s1960_s22  ;;  %v2221_v37 = vpop.permute.xlu1 %739 }
  0xd4   : >> { %583 = vrot.lane.b32.xlu0 %v568_v11, %s1960_s22  ;;  %581 = vrot.lane.b32.xlu1 %v567_v10, %s1960_s22 }
  0xd8   : >> { %587 = vrot.lane.b32.xlu0 %v570_v15, %s1960_s22  ;;  %585 = vrot.lane.b32.xlu1 %v569_v12, %s1960_s22 }
  0xdc   : >> { %624 = vrot.lane.b32.xlu0 %v611_v17, %s1961_s26  ;;  %622 = vrot.lane.b32.xlu1 %v610_v16, %s1961_s26 }
  0xe0   : >> { %628 = vrot.lane.b32.xlu0 %v613_v20, %s1961_s26  ;;  %626 = vrot.lane.b32.xlu1 %v612_v21, %s1961_s26 }
  0xe4   : >> { %632 = vrot.lane.b32.xlu0 %v615_v24, %s1961_s26  ;;  %630 = vrot.lane.b32.xlu1 %v614_v23, %s1961_s26 }
  0xe8   : >> { %669 = vrot.lane.b32.xlu0 %v656_v26, %s1962_s28  ;;  %667 = vrot.lane.b32.xlu1 %v655_v25, %s1962_s28 }
  0xec   : >> { %673 = vrot.lane.b32.xlu0 %v658_v27, %s1962_s28  ;;  %671 = vrot.lane.b32.xlu1 %v657_v28, %s1962_s28 }
  0xf0   : >> { %677 = vrot.lane.b32.xlu0 %v660_v30, %s1962_s28  ;;  %675 = vrot.lane.b32.xlu1 %v659_v29, %s1962_s28 }
  0xf4   : >> { %714 = vrot.lane.b32.xlu0 %v701_v32, %s1963_s29  ;;  %712 = vrot.lane.b32.xlu1 %v700_v31, %s1963_s29 }
  0xf8   : >> { %718 = vrot.lane.b32.xlu0 %v703_v34, %s1963_s29  ;;  %716 = vrot.lane.b32.xlu1 %v702_v33, %s1963_s29 }
  0xfc   : >> { %722 = vrot.lane.b32.xlu0 %v705_v36, %s1963_s29  ;;  %720 = vrot.lane.b32.xlu1 %v704_v35, %s1963_s29 }
 0x112   : >> { %v400_v39 = vpop.permute.xlu0 %399  ;;  %v398_v40 = vpop.permute.xlu1 %397 }
 0x113   : >> { %v410_v41 = vsel %vm409_vm0, %v398_v40, %v400_v39 }
 0x114   : >> { %v418_v42 = vadd.f32 %v410_v41, %v2175_v52 }
 0x116   : >> { %v404_v18 = vpop.permute.xlu0 %403  ;;  %v402_v43 = vpop.permute.xlu1 %401 }
 0x117   : >> { %v411_v44 = vsel %vm409_vm0, %v400_v39, %v402_v43 }
 0x118   : >> { %v419_v19 = vadd.f32 %v411_v44, %v2178_v53 }
 0x11a   : >> { %v408_v22 = vpop.permute.xlu0 %407  ;;  %v406_v45 = vpop.permute.xlu1 %405 }
 0x11b   : >> { %v412_v46 = vsel %vm409_vm0, %v404_v18, %v406_v45  ;;  %v413_v47 = vsel %vm409_vm0, %v406_v45, %v408_v22 }
 0x11c   : >> { %v2232_v48 = vadd.f32 %v412_v46, %v2191_v8  ;;  %v2235_v49 = vadd.f32 %v413_v47, %v2194_v9 }
 0x11e   : >> { %v445_v50 = vpop.permute.xlu0 %444  ;;  %v443_v51 = vpop.permute.xlu1 %442 }
 0x11f   : >> { %v455_v52 = vsel %vm454_vm1, %v443_v51, %v445_v50 }
 0x120   : >> { %v463_v54 = vadd.f32 %v455_v52, %v418_v42 }
 0x122   : >> { %v449_v55 = vpop.permute.xlu0 %448  ;;  %v447_v53 = vpop.permute.xlu1 %446 }
 0x123   : >> { %v456_v56 = vsel %vm454_vm1, %v445_v50, %v447_v53 }
 0x124   : >> { %v464_v57 = vadd.f32 %v456_v56, %v419_v19 }
 0x126   : >> { %v453_v58 = vpop.permute.xlu0 %452  ;;  %v451_v59 = vpop.permute.xlu1 %450 }
 0x127   : >> { %v457_v41 = vsel %vm454_vm1, %v449_v55, %v451_v59  ;;  %v458_v42 = vsel %vm454_vm1, %v451_v59, %v453_v58 }
 0x128   : >> { %v465_v51 = vadd.f32 %v457_v41, %v2232_v48  ;;  %v466_v52 = vadd.f32 %v458_v42, %v2235_v49 }
 0x12a   : >> { %v490_v60 = vpop.permute.xlu0 %489  ;;  %v488_v61 = vpop.permute.xlu1 %487 }
 0x12b   : >> { %v500_v31 = vsel %vm499_vm2, %v488_v61, %v490_v60 }
 0x12c   : >> { %v508_v33 = vadd.f32 %v500_v31, %v463_v54 }
 0x12e   : >> { %v494_v62 = vpop.permute.xlu0 %493  ;;  %v492_v63 = vpop.permute.xlu1 %491 }
 0x12f   : >> { %v501_v39 = vsel %vm499_vm2, %v490_v60, %v492_v63 }
 0x130   : >> { %v509_v45 = vadd.f32 %v501_v39, %v464_v57 }
 0x132   : >> { %v498_v4 = vpop.permute.xlu0 %497  ;;  %v496_v5 = vpop.permute.xlu1 %495 }
 0x133   : >> { %v502_v46 = vsel %vm499_vm2, %v494_v62, %v496_v5  ;;  %v503_v47 = vsel %vm499_vm2, %v496_v5, %v498_v4 }
 0x134   : >> { %v510_v59 = vadd.f32 %v502_v46, %v465_v51  ;;  %v511_v57 = vadd.f32 %v503_v47, %v466_v52 }
 0x136   : >> { %v535_v6 = vpop.permute.xlu0 %534  ;;  %v533_v7 = vpop.permute.xlu1 %532 }
 0x137   : >> { %v545_v32 = vsel %vm544_vm3, %v533_v7, %v535_v6 }
 0x138   : >> { %v553_v40 = vadd.f32 %v545_v32, %v508_v33 }
 0x13a   : >> { %v539_v8 = vpop.permute.xlu0 %538  ;;  %v537_v9 = vpop.permute.xlu1 %536 }
 0x13b   : >> { %v546_v43 = vsel %vm544_vm3, %v535_v6, %v537_v9 }
 0x13c   : >> { %v554_v53 = vadd.f32 %v546_v43, %v509_v45 }
 0x13e   : >> { %v543_v10 = vpop.permute.xlu0 %542  ;;  %v541_v11 = vpop.permute.xlu1 %540 }
 0x13f   : >> { %v547_v56 = vsel %vm544_vm3, %v539_v8, %v541_v11  ;;  %v548_v58 = vsel %vm544_vm3, %v541_v11, %v543_v10 }
 0x140   : >> { %v555_v6 = vadd.f32 %v547_v56, %v510_v59  ;;  %v556_v7 = vadd.f32 %v548_v58, %v511_v57 }
 0x142   : >> { %v580_v12 = vpop.permute.xlu0 %579  ;;  %v578_v15 = vpop.permute.xlu1 %577 }
 0x143   : >> { %v590_v36 = vsel %vm589_vm4, %v578_v15, %v580_v12 }
 0x144   : >> { %v598_v44 = vadd.f32 %v590_v36, %v553_v40 }
 0x146   : >> { %v584_v16 = vpop.permute.xlu0 %583  ;;  %v582_v17 = vpop.permute.xlu1 %581 }
 0x147   : >> { %v591_v54 = vsel %vm589_vm4, %v580_v12, %v582_v17 }
 0x148   : >> { %v599_v4 = vadd.f32 %v591_v54, %v554_v53 }
 0x14a   : >> { %v588_v20 = vpop.permute.xlu0 %587  ;;  %v586_v21 = vpop.permute.xlu1 %585 }
 0x14b   : >> { %v592_v48 = vsel %vm589_vm4, %v584_v16, %v586_v21  ;;  %v593_v49 = vsel %vm589_vm4, %v586_v21, %v588_v20 }
 0x14c   : >> { %v600_v15 = vadd.f32 %v592_v48, %v555_v6  ;;  %v601_v17 = vadd.f32 %v593_v49, %v556_v7 }
 0x14e   : >> { %v625_v23 = vpop.permute.xlu0 %624  ;;  %v623_v24 = vpop.permute.xlu1 %622 }
 0x14f   : >> { %v635_v18 = vsel %vm634_vm5, %v623_v24, %v625_v23 }
 0x150   : >> { %v643_v55 = vadd.f32 %v635_v18, %v598_v44 }
 0x152   : >> { %v629_v25 = vpop.permute.xlu0 %628  ;;  %v627_v26 = vpop.permute.xlu1 %626 }
 0x153   : >> { %v636_v60 = vsel %vm634_vm5, %v625_v23, %v627_v26 }
 0x154   : >> { %v644_v10 = vadd.f32 %v636_v60, %v599_v4 }
 0x156   : >> { %v633_v27 = vpop.permute.xlu0 %632  ;;  %v631_v28 = vpop.permute.xlu1 %630 }
 0x157   : >> { %v637_v11 = vsel %vm634_vm5, %v629_v25, %v631_v28  ;;  %v638_v12 = vsel %vm634_vm5, %v631_v28, %v633_v27 }
 0x158   : >> { %v646_v31 = vadd.f32 %v638_v12, %v601_v17 }
 0x15a   : >> { %v670_v29 = vpop.permute.xlu0 %669  ;;  %v668_v30 = vpop.permute.xlu1 %667 }
 0x15b   : >> { %v680_v50 = vsel %vm679_vm6, %v668_v30, %v670_v29  ;;  %v645_v30 = vadd.f32 %v637_v11, %v600_v15 }
 0x15c   : >> { %v688_v61 = vadd.f32 %v680_v50, %v643_v55 }
 0x15e   : >> { %v674_v34 = vpop.permute.xlu0 %673  ;;  %v672_v35 = vpop.permute.xlu1 %671 }
 0x15f   : >> { %v681_v8 = vsel %vm679_vm6, %v670_v29, %v672_v35 }
 0x160   : >> { %v689_v20 = vadd.f32 %v681_v8, %v644_v10 }
 0x162   : >> { %v678_v19 = vpop.permute.xlu0 %677  ;;  %v676_v22 = vpop.permute.xlu1 %675 }
 0x163   : >> { %v682_v21 = vsel %vm679_vm6, %v674_v34, %v676_v22  ;;  %v683_v26 = vsel %vm679_vm6, %v676_v22, %v678_v19 }
 0x164   : >> { %v690_v27 = vadd.f32 %v682_v21, %v645_v30  ;;  %v691_v28 = vadd.f32 %v683_v26, %v646_v31 }
 0x166   : >> { %v715_v62 = vpop.permute.xlu0 %714  ;;  %v713_v63 = vpop.permute.xlu1 %712 }
 0x167   : >> { %v725_v5 = vsel %vm2533_vm7, %v713_v63, %v715_v62 }
 0x168   : >> { %v733_v9 = vadd.f32 %v725_v5, %v688_v61 }
 0x16a   : >> { %v2263_v23 = vadd.f32 %v2221_v37, %v733_v9  ;;  %v719_v16 = vpop.permute.xlu0 %718  ;;  %v717_v24 = vpop.permute.xlu1 %716 }
 0x16b   : >> { %v726_v29 = vsel %vm2533_vm7, %v715_v62, %v717_v24 }
 0x16c   : >> { %v751_v25 = vand.u32 2147483647, %v2263_v23  ;;  %v734_v32 = vadd.f32 %v726_v29, %v689_v20  ;;  %v767_v63 = vmax.f32 %v2263_v23, 0.0  ;;  %vm787_vm8 = vcmp.lt.f32.partialorder %v2263_v23, -8.0 }
 0x16d   : >> { %vm795_vm10 = vcmp.gt.f32.partialorder %v2263_v23, 20.0 }
 0x16e   : >> { %v755_v33 = vsub.f32 0.0, %v751_v25  ;;  %v723_v35 = vpop.permute.xlu0 %722  ;;  %v721_v36 = vpop.permute.xlu1 %720  ;;  %v2270_v39 = vadd.f32 %v2221_v37, %v734_v32  ;;  %v2297_v32 = vld [vmem:[%s2526_s3 + $0x8] sm:$0xff] (%p334_p11) }
 0x16f   : >> { %v727_v40 = vsel %vm2533_vm7, %v719_v16, %v721_v36  ;;  %v728_v34 = vsel %vm2533_vm7, %v721_v36, %v723_v35 }
 0x170   : >> { %v759_v41 = vmul.f32 1.442695, %v755_v33  ;;  %v735_v42 = vadd.f32 %v727_v40, %v690_v27  ;;  %v736_v18 = vadd.f32 %v728_v34, %v691_v28  ;;  %v752_v43 = vand.u32 2147483647, %v2270_v39  ;;  %v2302_v27 = vld [vmem:[%s2527_s4] sm:$0xff] (%p334_p11)  ;;  %v2307_v28 = vld [vmem:[%s2527_s4 + $0x8] sm:$0xff] (%p334_p11) }
 0x171   : >> { %v768_v4 = vmax.f32 %v2270_v39, 0.0  ;;  %vm788_vm9 = vcmp.lt.f32.partialorder %v2270_v39, -8.0  ;;  %vm796_vm12 = vcmp.gt.f32.partialorder %v2270_v39, 20.0 }
 0x172   : >> { %1775 = vpow2.f32 %v759_v41  ;;  %v749_v44 = vadd.f32 %v2223_v38, %v735_v42  ;;  %v750_v19 = vadd.f32 %v2223_v38, %v736_v18  ;;  %v756_v22 = vsub.f32 0.0, %v752_v43 }
 0x174   : >> { %v753_v45 = vand.u32 2147483647, %v749_v44  ;;  %v754_v46 = vand.u32 2147483647, %v750_v19  ;;  %v761_v47 = vmul.f32 1.442695, %v756_v22 }
 0x175   : >> { %v769_v8 = vmax.f32 %v749_v44, 0.0  ;;  %v770_v10 = vmax.f32 %v750_v19, 0.0  ;;  %vm789_vm11 = vcmp.lt.f32.partialorder %v749_v44, -8.0  ;;  %vm790_vm13 = vcmp.lt.f32.partialorder %v750_v19, -8.0 }
 0x176   : >> { %v757_v37 = vsub.f32 0.0, %v753_v45  ;;  %v758_v50 = vsub.f32 0.0, %v754_v46  ;;  %1777 = vpow2.f32 %v761_v47  ;;  %vm797_vm14 = vcmp.gt.f32.partialorder %v749_v44, 20.0 }
 0x177   : >> { %vm798_vm15 = vcmp.gt.f32.partialorder %v750_v19, 20.0 }
 0x178   : >> { %v763_v51 = vmul.f32 1.442695, %v757_v37  ;;  %v765_v52 = vmul.f32 1.442695, %v758_v50 }
 0x17a   : >> { %1779 = vpow2.f32 %v763_v51 }
 0x17b   : >> { %1781 = vpow2.f32 %v765_v52 }
 0x17c   : >> { %v1776_v54 = vpop.eup %1775 }
 0x17d   : >> { %v771_v55 = vadd.f32 1.0, %v1776_v54 }
 0x17f   : >> { %1783 = vlog2.f32 %v771_v55 }
 0x180   : >> { %v1778_v53 = vpop.eup %1777 }
 0x181   : >> { %v772_v56 = vadd.f32 1.0, %v1778_v53 }
 0x183   : >> { %1785 = vlog2.f32 %v772_v56 }
 0x184   : >> { %v1780_v58 = vpop.eup %1779 }
 0x185   : >> { %v1782_v59 = vpop.eup %1781  ;;  %v773_v38 = vadd.f32 1.0, %v1780_v58 }
 0x186   : >> { %v774_v57 = vadd.f32 1.0, %v1782_v59 }
 0x187   : >> { %1787 = vlog2.f32 %v773_v38 }
 0x188   : >> { %1789 = vlog2.f32 %v774_v57 }
 0x189   : >> { %v1784_v60 = vpop.eup %1783 }
 0x18a   : >> { %v776_v61 = vmul.f32 0.6931472, %v1784_v60 }
 0x18c   : >> { %v783_v49 = vadd.f32 %v776_v61, %v767_v63 }
 0x18d   : >> { %v1786_v62 = vpop.eup %1785 }
 0x18e   : >> { %v778_v48 = vmul.f32 0.6931472, %v1786_v62  ;;  %v791_v12 = vsel %vm787_vm8, %v1776_v54, %v783_v49 }
 0x18f   : >> { %v799_v20 = vsel %vm795_vm10, %v2263_v23, %v791_v12  ;;  %v2292_v23 = vld [vmem:[%s2526_s3] sm:$0xff] (%p334_p11) }
 0x190   : >> { %v784_v6 = vadd.f32 %v778_v48, %v768_v4 }
 0x191   : >> { %v1788_v5 = vpop.eup %1787 }
 0x192   : >> { %v1790_v7 = vpop.eup %1789  ;;  %v780_v9 = vmul.f32 0.6931472, %v1788_v5  ;;  %v792_v17 = vsel %vm788_vm9, %v1778_v53, %v784_v6 }
 0x193   : >> { %v782_v11 = vmul.f32 0.6931472, %v1790_v7  ;;  %v800_v29 = vsel %vm796_vm12, %v2270_v39, %v792_v17 }
 0x194   : >> { %v785_v15 = vadd.f32 %v780_v9, %v769_v8 }
 0x195   : >> { %v786_v16 = vadd.f32 %v782_v11, %v770_v10  ;;  %336 = sbr.rel (!%p334_p11) target bundleno = 28 (0x1c), region = 118 }
 0x196   : >> { %v793_v24 = vsel %vm789_vm11, %v1780_v58, %v785_v15 }
 0x197   : >> { %v794_v21 = vsel %vm790_vm13, %v1782_v59, %v786_v16  ;;  %v801_v26 = vsel %vm797_vm14, %v749_v44, %v793_v24 }
 0x198   : >> { %v802_v30 = vsel %vm798_vm15, %v750_v19, %v794_v21  ;;  %v803_v31 = vpack.c.bf16 %v801_v26, %v799_v20 }
 0x199   : >> { %v804_v25 = vpack.c.bf16 %v802_v30, %v800_v29 }
 0x19a   : >> { %807 = vst [vmem:[%s806_s27] sm:$0xff] %v803_v31 }
 0x19b   : >> { %808 = vst [vmem:[%s806_s27 + $0x8] sm:$0xff] %v804_v25 }
 0x19c LB: >> { %s1592_s25 = sshll.u32 %s1933_s23, 8  ;;  %s1964_s26 = smov 127   ;;  %v1595_v3 = vcombine.high %v2292_v23, %v2297_v32  ;;  %vm937_vm8 = vcmask 130048   ;;  %v1971_v33 = vmov 0   ;;  %vm2539_vm7 = vcmask 228352   ;;  %s1933_s23 = sphi %s2309_s23, %s818_s23  }
 0x19d   : >> { %s2315_s16 = sshra.s32 %s1592_s25, 7  ;;  %s1965_s28 = smov 126   ;;  %1791 = vset.pattern.permute.xlu0 %v1971_v33  ;;  %1792 = vset.pattern.permute.xlu1 %v1971_v33  ;;  %v1594_v11 = vcombine.low %v2292_v23, %v2297_v32 }
 0x19e   : >> { %s1593_s17 = sshll.u32 %s2315_s16, 3  ;;  %s1966_s29 = smov 79   ;;  %1596 = vmatprep.mubr.msk.bf16.mxu0 %vm937_vm8, %v1595_v3 }
 0x19f   : >> { %s823_s22 = scalar_lea.vmem [#allocation2], %s1593_s17  ;;  %s1967_s14 = smov 78  }
 0x1a0   : >> { %s1968_s27 = smov 77   ;;  %s1969_s25 = smov 30  }
 0x1a1   : >> { %s818_s23 = sadd.s32 1, %s1933_s23  }
 0x1a2   : >> { %v825_v0 = vld [vmem:[%s823_s22 + $0x8] sm:$0xff]  ;;  %v824_v1 = vld [vmem:[%s823_s22] sm:$0xff]  ;;  %v826_v2 = vld [vmem:[%s823_s22 + $0x10] sm:$0xff]  ;;  %s1970_s22 = smov 29   ;;  %p815_p12 = scmp.ge.s32.totalorder %s818_s23, 10  }
 0x1a3   : >> { %832 = vrot.lane.b32.xlu0 %v825_v0, %s1964_s26  ;;  %830 = vrot.lane.b32.xlu1 %v824_v1, %s1964_s26  ;;  %v2382_v23 = vmov (%p815_p12), 0.0   ;;  %v2384_v32 = vmov (%p815_p12), 0.0   ;;  %s2386_s23 = smov (%p815_p12), 0  }
 0x1a4   : >> { %941 = vmatprep.subr.bf16.mxu0 %v825_v0 }
 0x1a5   : >> { %942 = vmatpush1.bf16.msra.mxu0 %v824_v1 }
 0x1a7   : >> { %834 = vrot.lane.b32.xlu0 %v826_v2, %s1964_s26  ;;  %843 = vrot.lane.b32.xlu1 %v825_v0, %s1965_s28  ;;  %s1972_s26 = smov 28  }
 0x1ab   : >> { %845 = vrot.lane.b32.xlu0 %v826_v2, %s1965_s28  ;;  %841 = vrot.lane.b32.xlu1 %v824_v1, %s1965_s28  ;;  %s1039_s28 = scalar_lea.vmem [#allocation3], %s1593_s17 }
 0x1af   : >> { %854 = vrot.lane.b32.xlu0 %v825_v0, %s1966_s29  ;;  %856 = vrot.lane.b32.xlu1 %v826_v2, %s1966_s29 }
 0x1b3   : >> { %852 = vrot.lane.b32.xlu0 %v824_v1, %s1966_s29  ;;  %865 = vrot.lane.b32.xlu1 %v825_v0, %s1967_s14 }
 0x1b7   : >> { %867 = vrot.lane.b32.xlu0 %v826_v2, %s1967_s14  ;;  %863 = vrot.lane.b32.xlu1 %v824_v1, %s1967_s14 }
 0x1bb   : >> { %876 = vrot.lane.b32.xlu0 %v825_v0, %s1968_s27  ;;  %878 = vrot.lane.b32.xlu1 %v826_v2, %s1968_s27 }
 0x1bf   : >> { %874 = vrot.lane.b32.xlu0 %v824_v1, %s1968_s27  ;;  %887 = vrot.lane.b32.xlu1 %v825_v0, %s1969_s25 }
 0x1c3   : >> { %889 = vrot.lane.b32.xlu0 %v826_v2, %s1969_s25  ;;  %885 = vrot.lane.b32.xlu1 %v824_v1, %s1969_s25 }
 0x1c7   : >> { %898 = vrot.lane.b32.xlu0 %v825_v0, %s1970_s22  ;;  %900 = vrot.lane.b32.xlu1 %v826_v2, %s1970_s22 }
 0x1cb   : >> { %896 = vrot.lane.b32.xlu0 %v824_v1, %s1970_s22  ;;  %909 = vrot.lane.b32.xlu1 %v825_v0, %s1972_s26 }
 0x1cf   : >> { %911 = vrot.lane.b32.xlu0 %v826_v2, %s1972_s26  ;;  %907 = vrot.lane.b32.xlu1 %v824_v1, %s1972_s26 }
 0x1d3   : >> { %920 = vperm.xlu0 %1791, %v2302_v27   ;;  %925 = vperm.xlu1 %1792, %v2307_v28  }
 0x215   : >> { %v833_v35 = vpop.permute.xlu0 %832  ;;  %v831_v36 = vpop.permute.xlu1 %830 }
 0x216   : >> { %v837_v41 = vsel %vm409_vm0, %v831_v36, %v833_v35 }
 0x219   : >> { %v835_v39 = vpop.permute.xlu0 %834  ;;  %v844_v40 = vpop.permute.xlu1 %843 }
 0x21a   : >> { %v838_v34 = vsel %vm409_vm0, %v833_v35, %v835_v39 }
 0x21b   : >> { %943 = vmatprep.subr.bf16.mxu0 %v838_v34 }
 0x21c   : >> { %944 = vmatpush1.bf16.msra.mxu0 %v837_v41 }
 0x21d   : >> { %v846_v42 = vpop.permute.xlu0 %845  ;;  %v842_v18 = vpop.permute.xlu1 %841 }
 0x21e   : >> { %v849_v43 = vsel %vm454_vm1, %v844_v40, %v846_v42  ;;  %v848_v44 = vsel %vm454_vm1, %v842_v18, %v844_v40 }
 0x21f   : >> { %945 = vmatprep.subr.bf16.mxu0 %v849_v43 }
 0x220   : >> { %946 = vmatpush1.bf16.msra.mxu0 %v848_v44 }
 0x221   : >> { %v855_v19 = vpop.permute.xlu0 %854  ;;  %v857_v22 = vpop.permute.xlu1 %856 }
 0x222   : >> { %v860_v45 = vsel %vm499_vm2, %v855_v19, %v857_v22 }
 0x223   : >> { %947 = vmatprep.subr.bf16.mxu0 %v860_v45 }
 0x225   : >> { %v853_v46 = vpop.permute.xlu0 %852  ;;  %v866_v47 = vpop.permute.xlu1 %865 }
 0x226   : >> { %v859_v37 = vsel %vm499_vm2, %v853_v46, %v855_v19 }
 0x227   : >> { %948 = vmatpush1.bf16.msra.mxu0 %v859_v37 }
 0x229   : >> { %v868_v50 = vpop.permute.xlu0 %867  ;;  %v864_v51 = vpop.permute.xlu1 %863 }
 0x22a   : >> { %v871_v52 = vsel %vm544_vm3, %v866_v47, %v868_v50  ;;  %v870_v54 = vsel %vm544_vm3, %v864_v51, %v866_v47 }
 0x22b   : >> { %949 = vmatprep.subr.bf16.mxu0 %v871_v52 }
 0x22c   : >> { %950 = vmatpush1.bf16.msra.mxu0 %v870_v54 }
 0x22d   : >> { %v877_v55 = vpop.permute.xlu0 %876  ;;  %v879_v53 = vpop.permute.xlu1 %878 }
 0x22e   : >> { %v882_v56 = vsel %vm589_vm4, %v877_v55, %v879_v53 }
 0x22f   : >> { %951 = vmatprep.subr.bf16.mxu0 %v882_v56 }
 0x231   : >> { %v875_v58 = vpop.permute.xlu0 %874  ;;  %v888_v59 = vpop.permute.xlu1 %887 }
 0x232   : >> { %v881_v38 = vsel %vm589_vm4, %v875_v58, %v877_v55 }
 0x233   : >> { %952 = vmatpush1.bf16.msra.mxu0 %v881_v38 }
 0x235   : >> { %v890_v57 = vpop.permute.xlu0 %889  ;;  %v886_v60 = vpop.permute.xlu1 %885 }
 0x236   : >> { %v893_v61 = vsel %vm634_vm5, %v888_v59, %v890_v57  ;;  %v892_v62 = vsel %vm634_vm5, %v886_v60, %v888_v59 }
 0x237   : >> { %953 = vmatprep.subr.bf16.mxu0 %v893_v61 }
 0x238   : >> { %954 = vmatpush1.bf16.msra.mxu0 %v892_v62 }
 0x239   : >> { %v899_v63 = vpop.permute.xlu0 %898  ;;  %v901_v4 = vpop.permute.xlu1 %900 }
 0x23a   : >> { %v904_v48 = vsel %vm679_vm6, %v899_v63, %v901_v4 }
 0x23b   : >> { %955 = vmatprep.subr.bf16.mxu0 %v904_v48 }
 0x23d   : >> { %v897_v49 = vpop.permute.xlu0 %896  ;;  %v910_v5 = vpop.permute.xlu1 %909 }
 0x23e   : >> { %v903_v6 = vsel %vm679_vm6, %v897_v49, %v899_v63 }
 0x23f   : >> { %956 = vmatpush1.bf16.msra.mxu0 %v903_v6 }
 0x241   : >> { %v912_v7 = vpop.permute.xlu0 %911  ;;  %v908_v8 = vpop.permute.xlu1 %907 }
 0x242   : >> { %v915_v9 = vsel %vm2539_vm7, %v910_v5, %v912_v7  ;;  %v914_v10 = vsel %vm2539_vm7, %v908_v8, %v910_v5 }
 0x243   : >> { %957 = vmatprep.subr.bf16.mxu0 %v915_v9 }
 0x244   : >> { %958 = vmatpush1.bf16.msra.mxu0 %v914_v10  ;;  %v2365_v10 = vld [vmem:[%s2528_s5] sm:$0xff] (%p815_p12) }
 0x247   : >> { %974 = vmatmul.mubr.bf16.vlgmr.msra.gmra.mrb[0].mxu0 %v1594_v11  ;;  %v2370_v11 = vld [vmem:[%s2528_s5 + $0x8] sm:$0xff] (%p815_p12) }
 0x252   : >> { %v921_v12 = vpop.permute.xlu0 %920  ;;  %v926_v20 = vpop.permute.xlu1 %925 }
 0x31a   : >> { %v975_v15 = vpop.f32.mrb[0].mxu0 }
 0x31b   : >> { %v2343_v17 = vadd.f32 %v975_v15, %v921_v12  ;;  %v977_v16 = vpop.f32.mrb[1].mxu0  ;;  %v2380_v15 = vld [vmem:[%s2529_s6 + $0x8] sm:$0xff] (%p815_p12) }
 0x31c   : >> { %v2345_v24 = vadd.f32 %v977_v16, %v921_v12  ;;  %v979_v21 = vpop.f32.mrb[2].mxu0  ;;  %v2375_v12 = vld [vmem:[%s2529_s6] sm:$0xff] (%p815_p12) }
 0x31d   : >> { %v984_v26 = vand.u32 2147483647, %v2343_v17  ;;  %v981_v29 = vpop.f32.mrb[3].mxu0  ;;  %v980_v25 = vadd.f32 %v979_v21, %v926_v20  ;;  %v1000_v37 = vmax.f32 %v2343_v17, 0.0  ;;  %vm1020_vm9 = vcmp.lt.f32.partialorder %v2343_v17, -8.0 }
 0x31e   : >> { %v985_v30 = vand.u32 2147483647, %v2345_v24  ;;  %v982_v0 = vadd.f32 %v981_v29, %v926_v20  ;;  %v1001_v51 = vmax.f32 %v2345_v24, 0.0  ;;  %vm1021_vm10 = vcmp.lt.f32.partialorder %v2345_v24, -8.0 }
 0x31f   : >> { %v988_v31 = vsub.f32 0.0, %v984_v26  ;;  %v986_v3 = vand.u32 2147483647, %v980_v25  ;;  %v1002_v58 = vmax.f32 %v980_v25, 0.0  ;;  %vm1028_vm11 = vcmp.gt.f32.partialorder %v2343_v17, 20.0 }
 0x320   : >> { %v989_v1 = vsub.f32 0.0, %v985_v30  ;;  %v987_v35 = vand.u32 2147483647, %v982_v0  ;;  %v1003_v38 = vmax.f32 %v982_v0, 0.0  ;;  %vm1022_vm12 = vcmp.lt.f32.partialorder %v980_v25, -8.0 }
 0x321   : >> { %v992_v2 = vmul.f32 1.442695, %v988_v31  ;;  %v990_v36 = vsub.f32 0.0, %v986_v3  ;;  %vm1029_vm13 = vcmp.gt.f32.partialorder %v2345_v24, 20.0  ;;  %vm1030_vm14 = vcmp.gt.f32.partialorder %v980_v25, 20.0 }
 0x322   : >> { %v994_v33 = vmul.f32 1.442695, %v989_v1  ;;  %v991_v39 = vsub.f32 0.0, %v987_v35  ;;  %vm1023_vm15 = vcmp.lt.f32.partialorder %v982_v0, -8.0  ;;  %vm1031_vm7 = vcmp.gt.f32.partialorder %v982_v0, 20.0 }
 0x323   : >> { %1793 = vpow2.f32 %v992_v2  ;;  %v996_v40 = vmul.f32 1.442695, %v990_v36 }
 0x324   : >> { %1795 = vpow2.f32 %v994_v33  ;;  %v998_v34 = vmul.f32 1.442695, %v991_v39 }
 0x325   : >> { %1797 = vpow2.f32 %v996_v40 }
 0x326   : >> { %1799 = vpow2.f32 %v998_v34 }
 0x32d   : >> { %v1794_v41 = vpop.eup %1793 }
 0x32e   : >> { %v1796_v42 = vpop.eup %1795  ;;  %v1004_v18 = vadd.f32 1.0, %v1794_v41 }
 0x32f   : >> { %v1005_v43 = vadd.f32 1.0, %v1796_v42  ;;  %v1798_v44 = vpop.eup %1797 }
 0x330   : >> { %1801 = vlog2.f32 %v1004_v18  ;;  %v1800_v19 = vpop.eup %1799  ;;  %v1006_v22 = vadd.f32 1.0, %v1798_v44 }
 0x331   : >> { %1803 = vlog2.f32 %v1005_v43  ;;  %v1007_v45 = vadd.f32 1.0, %v1800_v19 }
 0x332   : >> { %1805 = vlog2.f32 %v1006_v22 }
 0x333   : >> { %1807 = vlog2.f32 %v1007_v45 }
 0x33a   : >> { %v1802_v46 = vpop.eup %1801 }
 0x33b   : >> { %v1804_v47 = vpop.eup %1803  ;;  %v1009_v50 = vmul.f32 0.6931472, %v1802_v46 }
 0x33c   : >> { %v1011_v52 = vmul.f32 0.6931472, %v1804_v47  ;;  %v1806_v55 = vpop.eup %1805 }
 0x33d   : >> { %v1016_v54 = vadd.f32 %v1009_v50, %v1000_v37  ;;  %v1808_v56 = vpop.eup %1807  ;;  %v1013_v59 = vmul.f32 0.6931472, %v1806_v55 }
 0x33e   : >> { %v1017_v53 = vadd.f32 %v1011_v52, %v1001_v51  ;;  %v1015_v57 = vmul.f32 0.6931472, %v1808_v56 }
 0x33f   : >> { %v1024_v60 = vsel %vm1020_vm9, %v1794_v41, %v1016_v54  ;;  %v1018_v61 = vadd.f32 %v1013_v59, %v1002_v58 }
 0x340   : >> { %v1025_v62 = vsel %vm1021_vm10, %v1796_v42, %v1017_v53  ;;  %v1019_v63 = vadd.f32 %v1015_v57, %v1003_v38  ;;  %v1032_v48 = vsel %vm1028_vm11, %v2343_v17, %v1024_v60  ;;  %817 = sbr.rel (!%p815_p12) target bundleno = 412 (0x19c), region = 129 }
 0x341   : >> { %v1026_v4 = vsel %vm1022_vm12, %v1798_v44, %v1018_v61  ;;  %v1033_v6 = vsel %vm1029_vm13, %v2345_v24, %v1025_v62 }
 0x342   : >> { %v1034_v49 = vsel %vm1030_vm14, %v980_v25, %v1026_v4  ;;  %v1027_v5 = vsel %vm1023_vm15, %v1800_v19, %v1019_v63 }
 0x343   : >> { %v1036_v7 = vpack.c.bf16 %v1034_v49, %v1032_v48  ;;  %v1035_v8 = vsel %vm1031_vm7, %v982_v0, %v1027_v5 }
 0x344   : >> { %v1037_v9 = vpack.c.bf16 %v1035_v8, %v1033_v6 }
 0x345   : >> { %1040 = vst [vmem:[%s1039_s28] sm:$0xff] %v1036_v7 }
 0x346   : >> { %1041 = vst [vmem:[%s1039_s28 + $0x8] sm:$0xff] %v1037_v9 }
 0x347 LB: >> { %s1598_s28 = sshll.u32 %s1945_s23, 8  ;;  %s1973_s21 = smov 127   ;;  %v1601_v16 = vcombine.high %v2365_v10, %v2370_v11  ;;  %v1980_v24 = vmov 0   ;;  %vm2540_vm7 = vcmask 228352   ;;  %v1600_v61 = vcombine.low %v2365_v10, %v2370_v11  ;;  %s1945_s23 = sphi %s2386_s23, %s1051_s23   ;;  %v1941_v32 = vphi %v2384_v32, %v2543_v32   ;;  %v1937_v23 = vphi %v2382_v23, %v2542_v23  }
 0x348   : >> { %s1055_s29 = sshra.s32 %s1598_s28, 7  ;;  %s1271_s14 = sshra.s32 %s1598_s28, 3  ;;  %1809 = vset.pattern.permute.xlu0 %v1980_v24  ;;  %1810 = vset.pattern.permute.xlu1 %v1980_v24  ;;  %vm2541_vm9 = vmmov %vm2540_vm7 }
 0x349   : >> { %s1599_s27 = sshll.u32 %s1055_s29, 3  ;;  %s1603_s25 = sshll.u32 %s1271_s14, 2  ;;  %1602 = vmatprep.mubr.msk.bf16.mxu0 %vm937_vm8, %v1601_v16 }
 0x34a   : >> { %s1058_s16 = scalar_lea.vmem [#allocation3], %s1599_s27  ;;  %s2401_s26 = scalar_lea.vmem %s2530_s7, %s1603_s25 }
 0x34b   : >> { %s1974_s0 = smov 126   ;;  %s1975_s28 = smov 79   ;;  %v1811_v62 = vld [vmem:[%s2401_s26 + $0x40] sm:$0xff]   ;;  %v1813_v4 = vld [vmem:[%s2401_s26 + $0x48] sm:$0xff]   ;;  %v1815_v49 = vld [vmem:[%s2401_s26 + $0x50] sm:$0xff]  }
 0x34c   : >> { %s1976_s29 = smov 78   ;;  %s1977_s14 = smov 77   ;;  %v1812_v63 = vld [vmem:[%s2401_s26] sm:$0xff]   ;;  %1623 = vmatprep.subr.bf16.mxu1 %v1811_v62  ;;  %v1814_v48 = vld [vmem:[%s2401_s26 + $0x8] sm:$0xff]   ;;  %v1816_v5 = vld [vmem:[%s2401_s26 + $0x10] sm:$0xff]  }
 0x34d   : >> { %v1060_v27 = vld [vmem:[%s1058_s16 + $0x8] sm:$0xff]  ;;  %v1059_v28 = vld [vmem:[%s1058_s16] sm:$0xff]  ;;  %v1061_v17 = vld [vmem:[%s1058_s16 + $0x10] sm:$0xff]  ;;  %s1978_s27 = smov 30   ;;  %1624 = vmatpush3.bf16.msra.mxu1 %v1812_v63  ;;  %s1051_s23 = sadd.s32 1, %s1945_s23  }
 0x34e   : >> { %1067 = vrot.lane.b32.xlu0 %v1060_v27, %s1973_s21  ;;  %1065 = vrot.lane.b32.xlu1 %v1059_v28, %s1973_s21  ;;  %v1817_v6 = vld [vmem:[%s2401_s26 + $0x58] sm:$0xff]   ;;  %v1819_v8 = vld [vmem:[%s2401_s26 + $0x60] sm:$0xff]   ;;  %p1048_p13 = scmp.ge.s32.totalorder %s1051_s23, 9  }
 0x34f   : >> { %1176 = vmatprep.subr.bf16.mxu0 %v1060_v27  ;;  %1625 = vmatprep.subr.bf16.mxu1 %v1813_v4  ;;  %v1818_v7 = vld [vmem:[%s2401_s26 + $0x18] sm:$0xff]   ;;  %v1820_v9 = vld [vmem:[%s2401_s26 + $0x20] sm:$0xff]   ;;  %v1824_v16 = vld [vmem:[%s2401_s26 + $0x30] sm:$0xff]   ;;  %s1982_s23 = smov (%p1048_p13), 112   ;;  %s1620_s17 = sshll.u32 (%p1048_p13), %s2055_s13, 4 }
 0x350   : >> { %1177 = vmatpush1.bf16.msra.mxu0 %v1059_v28  ;;  %v1825_v24 = vld [vmem:[%s2401_s26 + $0x78] sm:$0xff]   ;;  %s1499_s22 = sshll.u32 (%p1048_p13), %s2112_s24, 4  ;;  %s1983_s13 = smov (%p1048_p13), [#allocation4]   ;;  %s2480_s22 = int_to_ptr.vmem [resolvable:$true] %s1499_s22 }
 0x351   : >> { %1626 = vmatpush3.bf16.msra.mxu1 %v1814_v48 }
 0x352   : >> { %1069 = vrot.lane.b32.xlu0 %v1061_v17, %s1973_s21  ;;  %1078 = vrot.lane.b32.xlu1 %v1060_v27, %s1974_s0  ;;  %s1981_s21 = smov 28  }
 0x353   : >> { %1627 = vmatprep.subr.bf16.mxu1 %v1815_v49 }
 0x355   : >> { %1628 = vmatpush3.bf16.msra.mxu1 %v1816_v5 }
 0x356   : >> { %1080 = vrot.lane.b32.xlu0 %v1061_v17, %s1974_s0  ;;  %1076 = vrot.lane.b32.xlu1 %v1059_v28, %s1974_s0  ;;  %s1979_s0 = smov 29  }
 0x357   : >> { %1629 = vmatprep.subr.bf16.mxu1 %v1817_v6 }
 0x359   : >> { %1630 = vmatpush3.bf16.msra.mxu1 %v1818_v7 }
 0x35a   : >> { %1089 = vrot.lane.b32.xlu0 %v1060_v27, %s1975_s28  ;;  %1091 = vrot.lane.b32.xlu1 %v1061_v17, %s1975_s28 }
 0x35b   : >> { %1631 = vmatprep.subr.bf16.mxu1 %v1819_v8 }
 0x35d   : >> { %1632 = vmatpush3.bf16.msra.mxu1 %v1820_v9 }
 0x35e   : >> { %1087 = vrot.lane.b32.xlu0 %v1059_v28, %s1975_s28  ;;  %1100 = vrot.lane.b32.xlu1 %v1060_v27, %s1976_s29 }
 0x362   : >> { %1102 = vrot.lane.b32.xlu0 %v1061_v17, %s1976_s29  ;;  %1098 = vrot.lane.b32.xlu1 %v1059_v28, %s1976_s29  ;;  %s2478_s29 = scalar_lea.hbm (%p1048_p13), %s2532_s9, %s1620_s17 }
 0x366   : >> { %1111 = vrot.lane.b32.xlu0 %v1060_v27, %s1977_s14  ;;  %1113 = vrot.lane.b32.xlu1 %v1061_v17, %s1977_s14 }
 0x36a   : >> { %1109 = vrot.lane.b32.xlu0 %v1059_v28, %s1977_s14  ;;  %1122 = vrot.lane.b32.xlu1 %v1060_v27, %s1978_s27  ;;  %s2544_s14 = sand.u32 (%p1048_p13), 1, %s1917_s10  }
 0x36e   : >> { %1124 = vrot.lane.b32.xlu0 %v1061_v17, %s1978_s27  ;;  %1120 = vrot.lane.b32.xlu1 %v1059_v28, %s1978_s27  ;;  %s1487_s27 = scalar_lea.sflag (%p1048_p13), [#allocation5], %s2544_s14 }
 0x372   : >> { %1133 = vrot.lane.b32.xlu0 %v1060_v27, %s1979_s0  ;;  %1135 = vrot.lane.b32.xlu1 %v1061_v17, %s1979_s0 }
 0x376   : >> { %1131 = vrot.lane.b32.xlu0 %v1059_v28, %s1979_s0  ;;  %1144 = vrot.lane.b32.xlu1 %v1060_v27, %s1981_s21  ;;  %v1821_v27 = vld [vmem:[%s2401_s26 + $0x68] sm:$0xff]   ;;  %s1843_s0 = scalar_lea.vmem (%p1048_p13), %s2480_s22, 16 }
 0x377   : >> { %1633 = vmatprep.subr.bf16.mxu1 %v1821_v27  ;;  %p1844_p0 = scmp.ne.s32.totalorder (%p1048_p13), %s2480_s22, %s1843_s0 }
 0x379   : > { %p1845_p1 = pnand (%p1048_p13), %p1844_p0, %p2072_p5 }
 0x37a   : >> { %1146 = vrot.lane.b32.xlu0 %v1061_v17, %s1981_s21  ;;  %1142 = vrot.lane.b32.xlu1 %v1059_v28, %s1981_s21  ;;  %v1822_v28 = vld [vmem:[%s2401_s26 + $0x28] sm:$0xff]   ;;  %v1823_v17 = vld [vmem:[%s2401_s26 + $0x70] sm:$0xff]   ;;  %s1847_s21 = sshll.u32 (%p1048_p13), %s1983_s13, 4  ;;  %s1848_s21 = int_to_ptr.vmem [resolvable:$false] %s1847_s21 }
 0x37b   : >> { %1634 = vmatpush3.bf16.msra.mxu1 %v1822_v28  ;;  %p1846_p2 = pneg (%p1048_p13), %p1845_p1  ;;  %p1850_p3 = scmp.lt.s32.totalorder (%p1048_p13), %s2480_s22, %s1848_s21 }
 0x37c   : >> { %1635 = vmatprep.subr.bf16.mxu1 %v1823_v17 }
 0x37e   : >> { %1155 = vperm.xlu0 %1809, %v2375_v12   ;;  %1160 = vperm.xlu1 %1810, %v2380_v15  }
 0x37f   : >> { %1636 = vmatpush3.bf16.msra.mxu1 %v1824_v16 }
 0x380   : >> { %1637 = vmatprep.subr.bf16.mxu1 %v1825_v24 }
 0x3c0   : >> { %v1068_v20 = vpop.permute.xlu0 %1067  ;;  %v1066_v21 = vpop.permute.xlu1 %1065 }
 0x3c1   : >> { %v1072_v31 = vsel %vm409_vm0, %v1066_v21, %v1068_v20 }
 0x3c4   : >> { %v1070_v26 = vpop.permute.xlu0 %1069  ;;  %v1079_v29 = vpop.permute.xlu1 %1078 }
 0x3c5   : >> { %v1073_v30 = vsel %vm409_vm0, %v1068_v20, %v1070_v26  ;;  %v1826_v20 = vld [vmem:[%s2401_s26 + $0x38] sm:$0xff]  }
 0x3c6   : >> { %1178 = vmatprep.subr.bf16.mxu0 %v1073_v30  ;;  %1638 = vmatpush3.bf16.msra.mxu1 %v1826_v20 }
 0x3c7   : >> { %1179 = vmatpush1.bf16.msra.mxu0 %v1072_v31 }
 0x3c8   : >> { %v1081_v25 = vpop.permute.xlu0 %1080  ;;  %v1077_v0 = vpop.permute.xlu1 %1076 }
 0x3c9   : >> { %v1084_v1 = vsel %vm454_vm1, %v1079_v29, %v1081_v25  ;;  %v1083_v2 = vsel %vm454_vm1, %v1077_v0, %v1079_v29 }
 0x3ca   : >> { %1180 = vmatprep.subr.bf16.mxu0 %v1084_v1 }
 0x3cb   : >> { %1181 = vmatpush1.bf16.msra.mxu0 %v1083_v2 }
 0x3cc   : >> { %v1090_v3 = vpop.permute.xlu0 %1089  ;;  %v1092_v33 = vpop.permute.xlu1 %1091 }
 0x3cd   : >> { %v1095_v35 = vsel %vm499_vm2, %v1090_v3, %v1092_v33 }
 0x3ce   : >> { %1182 = vmatprep.subr.bf16.mxu0 %v1095_v35 }
 0x3d0   : >> { %v1088_v36 = vpop.permute.xlu0 %1087  ;;  %v1101_v39 = vpop.permute.xlu1 %1100 }
 0x3d1   : >> { %v1094_v40 = vsel %vm499_vm2, %v1088_v36, %v1090_v3 }
 0x3d2   : >> { %1183 = vmatpush1.bf16.msra.mxu0 %v1094_v40 }
 0x3d4   : >> { %v1103_v34 = vpop.permute.xlu0 %1102  ;;  %v1099_v41 = vpop.permute.xlu1 %1098 }
 0x3d5   : >> { %v1106_v42 = vsel %vm544_vm3, %v1101_v39, %v1103_v34  ;;  %v1105_v18 = vsel %vm544_vm3, %v1099_v41, %v1101_v39 }
 0x3d6   : >> { %1184 = vmatprep.subr.bf16.mxu0 %v1106_v42 }
 0x3d7   : >> { %1185 = vmatpush1.bf16.msra.mxu0 %v1105_v18 }
 0x3d8   : >> { %v1112_v43 = vpop.permute.xlu0 %1111  ;;  %v1114_v44 = vpop.permute.xlu1 %1113 }
 0x3d9   : >> { %v1117_v19 = vsel %vm589_vm4, %v1112_v43, %v1114_v44 }
 0x3da   : >> { %1186 = vmatprep.subr.bf16.mxu0 %v1117_v19 }
 0x3dc   : >> { %v1110_v22 = vpop.permute.xlu0 %1109  ;;  %v1123_v45 = vpop.permute.xlu1 %1122 }
 0x3dd   : >> { %v1116_v46 = vsel %vm589_vm4, %v1110_v22, %v1112_v43 }
 0x3de   : >> { %1187 = vmatpush1.bf16.msra.mxu0 %v1116_v46 }
 0x3e0   : >> { %v1125_v47 = vpop.permute.xlu0 %1124  ;;  %v1121_v37 = vpop.permute.xlu1 %1120 }
 0x3e1   : >> { %v1128_v50 = vsel %vm634_vm5, %v1123_v45, %v1125_v47  ;;  %v1127_v51 = vsel %vm634_vm5, %v1121_v37, %v1123_v45 }
 0x3e2   : >> { %1188 = vmatprep.subr.bf16.mxu0 %v1128_v50 }
 0x3e3   : >> { %1189 = vmatpush1.bf16.msra.mxu0 %v1127_v51 }
 0x3e4   : >> { %v1134_v52 = vpop.permute.xlu0 %1133  ;;  %v1136_v54 = vpop.permute.xlu1 %1135 }
 0x3e5   : >> { %v1139_v55 = vsel %vm679_vm6, %v1134_v52, %v1136_v54 }
 0x3e6   : >> { %1190 = vmatprep.subr.bf16.mxu0 %v1139_v55 }
 0x3e8   : >> { %v1132_v53 = vpop.permute.xlu0 %1131  ;;  %v1145_v56 = vpop.permute.xlu1 %1144 }
 0x3e9   : >> { %v1138_v58 = vsel %vm679_vm6, %v1132_v53, %v1134_v52 }
 0x3ea   : >> { %1191 = vmatpush1.bf16.msra.mxu0 %v1138_v58 }
 0x3ec   : >> { %v1147_v59 = vpop.permute.xlu0 %1146  ;;  %v1143_v38 = vpop.permute.xlu1 %1142 }
 0x3ed   : >> { %v1150_v57 = vsel %vm2540_vm7, %v1145_v56, %v1147_v59  ;;  %v1149_v60 = vsel %vm2541_vm9, %v1143_v38, %v1145_v56 }
 0x3ee   : >> { %1192 = vmatprep.subr.bf16.mxu0 %v1150_v57 }
 0x3ef   : >> { %1193 = vmatpush1.bf16.msra.mxu0 %v1149_v60 }
 0x3f2   : >> { %1209 = vmatmul.mubr.bf16.vlgmr.msra.gmra.mrb[0].mxu0 %v1600_v61 }
 0x3fd   : >> { %v1156_v21 = vpop.permute.xlu0 %1155  ;;  %v1161_v29 = vpop.permute.xlu1 %1160 }
 0x4c5   : >> { %v1210_v26 = vpop.f32.mrb[0].mxu0 }
 0x4c6   : >> { %v2442_v30 = vadd.f32 %v1210_v26, %v1156_v21  ;;  %v1212_v31 = vpop.f32.mrb[1].mxu0 }
 0x4c7   : >> { %v2444_v25 = vadd.f32 %v1212_v31, %v1156_v21  ;;  %v1214_v0 = vpop.f32.mrb[2].mxu0 }
 0x4c8   : >> { %v1219_v1 = vand.u32 2147483647, %v2442_v30  ;;  %v1215_v2 = vadd.f32 %v1214_v0, %v1161_v29  ;;  %v1216_v3 = vpop.f32.mrb[3].mxu0  ;;  %v1235_v53 = vmax.f32 %v2442_v30, 0.0  ;;  %vm1255_vm10 = vcmp.lt.f32.partialorder %v2442_v30, -8.0 }
 0x4c9   : >> { %v1220_v33 = vand.u32 2147483647, %v2444_v25  ;;  %v1217_v35 = vadd.f32 %v1216_v3, %v1161_v29  ;;  %v1236_v59 = vmax.f32 %v2444_v25, 0.0  ;;  %vm1256_vm11 = vcmp.lt.f32.partialorder %v2444_v25, -8.0 }
 0x4ca   : >> { %v1223_v36 = vsub.f32 0.0, %v1219_v1  ;;  %v1221_v39 = vand.u32 2147483647, %v1215_v2  ;;  %v1237_v60 = vmax.f32 %v1215_v2, 0.0  ;;  %vm1264_vm12 = vcmp.gt.f32.partialorder %v2444_v25, 20.0 }
 0x4cb   : >> { %v1224_v40 = vsub.f32 0.0, %v1220_v33  ;;  %v1222_v34 = vand.u32 2147483647, %v1217_v35  ;;  %v1238_v63 = vmax.f32 %v1217_v35, 0.0  ;;  %vm1257_vm13 = vcmp.lt.f32.partialorder %v1215_v2, -8.0 }
 0x4cc   : >> { %v1227_v41 = vmul.f32 1.442695, %v1223_v36  ;;  %v1225_v42 = vsub.f32 0.0, %v1221_v39  ;;  %vm1258_vm14 = vcmp.lt.f32.partialorder %v1217_v35, -8.0  ;;  %vm1263_vm15 = vcmp.gt.f32.partialorder %v2442_v30, 20.0 }
 0x4cd   : >> { %v1229_v18 = vmul.f32 1.442695, %v1224_v40  ;;  %v1226_v43 = vsub.f32 0.0, %v1222_v34  ;;  %vm1265_vm7 = vcmp.gt.f32.partialorder %v1215_v2, 20.0  ;;  %vm1266_vm9 = vcmp.gt.f32.partialorder %v1217_v35, 20.0 }
 0x4ce   : >> { %1827 = vpow2.f32 %v1227_v41  ;;  %v1231_v44 = vmul.f32 1.442695, %v1225_v42 }
 0x4cf   : >> { %1829 = vpow2.f32 %v1229_v18  ;;  %v1233_v19 = vmul.f32 1.442695, %v1226_v43  ;;  %v1483_v43 = vld [vmem:[%s2531_s8] sm:$0x1] (%p1048_p13) }
 0x4d0   : >> { %1831 = vpow2.f32 %v1231_v44 }
 0x4d1   : >> { %1833 = vpow2.f32 %v1233_v19 }
 0x4d8   : >> { %v1828_v22 = vpop.eup %1827 }
 0x4d9   : >> { %v1830_v45 = vpop.eup %1829  ;;  %v1239_v46 = vadd.f32 1.0, %v1828_v22 }
 0x4da   : >> { %v1832_v47 = vpop.eup %1831  ;;  %v1240_v37 = vadd.f32 1.0, %v1830_v45 }
 0x4db   : >> { %v1834_v50 = vpop.eup %1833  ;;  %v1241_v51 = vadd.f32 1.0, %v1832_v47  ;;  %1835 = vlog2.f32 %v1239_v46 }
 0x4dc   : >> { %v1242_v52 = vadd.f32 1.0, %v1834_v50  ;;  %1837 = vlog2.f32 %v1240_v37 }
 0x4dd   : >> { %1839 = vlog2.f32 %v1241_v51 }
 0x4de   : >> { %1841 = vlog2.f32 %v1242_v52 }
 0x4e5   : >> { %v1836_v54 = vpop.eup %1835 }
 0x4e6   : >> { %v1838_v55 = vpop.eup %1837  ;;  %v1244_v56 = vmul.f32 0.6931472, %v1836_v54 }
 0x4e7   : >> { %v1840_v58 = vpop.eup %1839  ;;  %v1246_v38 = vmul.f32 0.6931472, %v1838_v55 }
 0x4e8   : >> { %v1842_v57 = vpop.eup %1841  ;;  %v1248_v61 = vmul.f32 0.6931472, %v1840_v58  ;;  %v1251_v62 = vadd.f32 %v1244_v56, %v1235_v53 }
 0x4e9   : >> { %v1250_v4 = vmul.f32 0.6931472, %v1842_v57  ;;  %v1252_v48 = vadd.f32 %v1246_v38, %v1236_v59 }
 0x4ea   : >> { %v1253_v49 = vadd.f32 %v1248_v61, %v1237_v60  ;;  %v1259_v5 = vsel %vm1255_vm10, %v1828_v22, %v1251_v62  ;;  %vm1458_vm10 = vcmask (%p1048_p13), 261120  }
 0x4eb   : >> { %v1254_v6 = vadd.f32 %v1250_v4, %v1238_v63  ;;  %v1260_v7 = vsel %vm1256_vm11, %v1830_v45, %v1252_v48  ;;  %v1267_v27 = vsel %vm1263_vm15, %v2442_v30, %v1259_v5  ;;  %v1450_v30 = vadd.s32 (%p1048_p13), 8, %v2143_v14 }
 0x4ec   : >> { %v1261_v8 = vsel %vm1257_vm13, %v1832_v47, %v1253_v49  ;;  %v1268_v17 = vsel %vm1264_vm12, %v2444_v25, %v1260_v7  ;;  %v1452_v25 = vand.u32 (%p1048_p13), 127, %v354_v13 }
 0x4ed   : >> { %v1262_v9 = vsel %vm1258_vm14, %v1834_v50, %v1254_v6  ;;  %v1269_v28 = vsel %vm1265_vm7, %v1215_v2, %v1261_v8 }
 0x4ee   : >> { %v1270_v16 = vsel %vm1266_vm9, %v1217_v35, %v1262_v9  ;;  %v1307_v24 = vpack.c.bf16 %v1269_v28, %v1267_v27  ;;  %v1453_v2 = vand.u32 (%p1048_p13), 15, %v1452_v25  ;;  %vm1480_vm0 = vcmp.eq.s32.totalorder (%p1048_p13), %v1452_v25, 1 }
 0x4ef   : >> { %v1308_v20 = vpack.c.bf16 %v1270_v16, %v1268_v17  ;;  %vm1479_vm1 = vcmp.eq.s32.totalorder (%p1048_p13), %v1452_v25, 0 }
 0x4f0   : > { %vm1454_vm11 = vcmp.eq.s32.totalorder (%p1048_p13), %v1453_v2, %v2143_v14  ;;  %vm1455_vm12 = vcmp.eq.s32.totalorder (%p1048_p13), %v1453_v2, %v1450_v30 }
 0x4f1   : >> { %1437 = vmatprep.mubr.bf16.mxu1 %v1308_v20 }
 0x4f2   : >> { %1438 = vmatmul.mubr.bf16.vlgmr.msra.gmra.mrb[0].mxu1 %v1307_v24 }
 0x5c5   : >> { %v1639_v21 = vpop.f32.mrb[0].mxu1 }
 0x5c6   : >> { %v1640_v26 = vpop.f32.mrb[1].mxu1 }
 0x5c7   : >> { %v1641_v29 = vadd.f32 %v1640_v26, %v1639_v21  ;;  %v1642_v31 = vpop.f32.mrb[2].mxu1  ;;  %1050 = sbr.rel (!%p1048_p13) target bundleno = 839 (0x347), region = 140 }
 0x5c8   : >> { %v1643_v0 = vpop.f32.mrb[3].mxu1 }
 0x5c9   : >> { %v1446_v1 = vadd.f32 %v1941_v32, %v1641_v29   ;;  %v1644_v3 = vadd.f32 %v1643_v0, %v1642_v31 }
 0x5cb   : >> { %v1447_v33 = vadd.f32 %v1937_v23, %v1644_v3   ;;  %v2543_v32 = vmov %v1446_v1 }
 0x5cc   : > { %v1456_v32 = vsel (%p1048_p13), %vm1454_vm11, %v1446_v1, 0.0 }
 0x5cd   : >> { %v2542_v23 = vmov %v1447_v33  ;;  %v1457_v35 = vsel (%p1048_p13), %vm1455_vm12, %v1447_v33, 0.0  ;;  %v1459_v36 = vsel (%p1048_p13), %vm1458_vm10, %v1456_v32, 0.0 }
 0x5ce   : > { %v1460_v39 = vsel %vm1458_vm10, %v1457_v35, 0.0 }
 0x5cf   : > { %v1461_v40 = vadd.f32 %v1460_v39, %v1459_v36 }
 0x5d1   : > { %v1462_v34 = vrot.slane %v1461_v40, 4 }
 0x5d3   : > { %v1463_v41 = vadd.f32 %v1462_v34, %v1461_v40 }
 0x5d5   : > { %v1464_v42 = vrot.slane %v1463_v41, 2 }
 0x5d7   : > { %v1465_v18 = vadd.f32 %v1464_v42, %v1463_v41 }
 0x5d9   : > { %v1466_v10 = vrot.slane %v1465_v18, 1 }
 0x5db   : > { %v1467_v11 = vadd.f32 %v1466_v10, %v1465_v18 }
 0x5dd   : > { %1473 = vrot.lane.b32.xlu0 %v1467_v11, %s1982_s23  ;;  %v1469_v13 = vsel %vm937_vm8, %v1467_v11, 0.0  ;;  %s1849_s23 = scalar_lea.vmem %s1848_s21, 32 }
 0x5de   : > { %1470 = vadd.xlane.f32.xlu1 %v1469_v13  ;;  %p1851_p4 = scmp.lt.s32.totalorder %s1849_s23, %s1843_s0 }
 0x5e0   : > { %p1852_p7 = por %p1851_p4, %p1850_p3 }
 0x5e2   : > { %p1853_p8 = pnand %p1852_p7, %p1846_p2 }
 0x64f   : > { %v1474_v14 = vpop.permute.xlu0 %1473 }
 0x650   : > { %v1476_v12 = vsel %vm937_vm8, %v1474_v14, 0.0 }
 0x651   : > { %1477 = vadd.xlane.f32.xlu0 %v1476_v12 }
 0x66b   : > { %v1471_v15 = vpop.xlane.xlu1 %1470 }
 0x6de   : > { %v1478_v23 = vpop.xlane.xlu0 %1477 }
 0x6df   : > { %v1481_v44 = vsel %vm1480_vm0, %v1478_v23, 0.0 }
 0x6e0   : > { %v1482_v19 = vsel %vm1479_vm1, %v1471_v15, %v1481_v44 }
 0x6e1   : > { %v1484_v22 = vadd.f32 %v1483_v43, %v1482_v19 }
 0x6e3   : > { %1485 = vst [vmem:[%s2112_s24] sm:$0x1] %v1484_v22 }
 0x6e4   : > { %1856 = shalt.err (!%p1853_p8)
}
 0x6e5   : > { %s1857_s24 = scalar_lea.hbm %s2478_s29, 16  ;;  %s1861_s17 = scalar_lea.hbm %s2532_s9, 32 }
 0x6e6   : > { %p1858_p9 = scmp.ne.s32.totalorder %s2478_s29, %s1857_s24  ;;  %p1862_p12 = scmp.lt.u32.totalorder %s2478_s29, %s2532_s9 }
 0x6e7   : > { %p1863_p13 = scmp.lt.u32.totalorder %s1861_s17, %s1857_s24  ;;  %p1865_p1 = scmp.lt.u32.totalorder %s1857_s24, %s2478_s29 }
 0x6e8   : > { %p1859_p10 = pnand %p1858_p9, %p2072_p5 }
 0x6e9   : > { %p1864_p0 = por %p1863_p13, %p1862_p12 }
 0x6ea   : > { %p1860_p11 = pneg %p1859_p10 }
 0x6eb   : > { %p1866_p2 = por %p1865_p1, %p1864_p0 }
 0x6ed   : > { %p1867_p3 = pnand %p1866_p2, %p1860_p11 }
 0x6ef   : > { %1870 = shalt.err (!%p1867_p3)
}
 0x6f0   : > { %1646 = dma.vmem_to_hbm [thread:$0]  (%p2072_p5), %s2480_s22, 16, %s2478_s29, %s1487_s27  }
 0x6f1 PF: > { %p1652_p4 = scmp.ge.s32.totalorder %s1925_s12, 2  ;;  %s1511_s14 = sand.u32 1, %s1913_s30  }
 0x6f2   : > { %s1512_s0 = scalar_lea.sflag [#allocation5], %s1511_s14 }
 0x6f3   : > { %p1649_p7 = pnand %p1652_p4, %p2076_p6 }
 0x6f5   : > { %1908 = dma.done.wait (!%p1649_p7), %s1512_s0, 16  }
 0x6f6   : > { %1910 = vsyncadd (!%p1649_p7), %s1512_s0, 4294967280  ;;  %p19_p8 = scmp.ge.s32.totalorder %s2059_s15, 4   ;;  %s2545_s30 = smov %s1917_s10 }
 0x6f7   : > { %s2546_s10 = smov %s1921_s11  ;;  %s2547_s11 = smov %s2070_s18 }
 0x6f8   : > { %s2548_s12 = smov %s2059_s15  ;;  %21 = sbr.rel (!%p19_p8) target bundleno = 5 (0x5), region = 151 }
 0x6ff   :  { %1516 = vsyncpa [#allocation5], 1 }
 0x700   :  { %1518 = vsyncpa [#allocation5 + $0x1], 1 }

</bundles_post_ra>
